<compile_context>
chip_gen: v7x
topology: tpu7x:2x2x1
jax: 0.10.0
libtpu: 0.0.40
codegen_flags: <defaults>
</compile_context>

<pallas_src>
import functools

import numpy as np
import jax
import jax.numpy as jnp
from jax import lax
from jax.experimental import pallas as pl
from jax.experimental.pallas import tpu as pltpu

_EPS = float(np.finfo(np.float64).eps)  # sonopy.safe_log clips to float64 eps


def _round_up(x, m):
    return (x + m - 1) // m * m


# ----------------------------------------------------------------------------
# Host-side (trace-time) constant matrices — exactly mirror sonopy's math.
# ----------------------------------------------------------------------------
def _dft_matrices(fft_size):
    """Real-input DFT as two dense matmuls: re = x @ C, im = -(x @ S)."""
    n = np.arange(fft_size, dtype=np.float64)[:, None]
    k = np.arange(fft_size // 2 + 1, dtype=np.float64)[None, :]
    ang = 2.0 * np.pi * n * k / float(fft_size)
    return np.cos(ang), np.sin(ang)  # each (fft_size, n_bins)


def _filterbanks(sample_rate, num_filt, fft_len):
    """Identical to sonopy.filterbanks (triangular mel filters)."""
    def hertz_to_mels(f):
        return 1127.0 * np.log(1.0 + f / 700.0)

    def mel_to_hertz(mel):
        return 700.0 * (np.exp(mel / 1127.0) - 1.0)

    mels = np.linspace(hertz_to_mels(0.0), hertz_to_mels(sample_rate),
                       num_filt + 2, True)
    grid_hertz = mel_to_hertz(mels)
    grid_indices = (grid_hertz * fft_len / sample_rate).astype(int)

    banks = np.zeros([num_filt, fft_len])
    for i, (left, middle, right) in enumerate(
            zip(grid_indices, grid_indices[1:], grid_indices[2:])):
        banks[i, left:middle] = np.linspace(0.0, 1.0, middle - left, False)
        banks[i, middle:right] = np.linspace(1.0, 0.0, right - middle, False)
    return banks  # (num_filt, fft_len)


def _dct_matrix(num_filt, num_coeffs):
    """scipy.fftpack.dct(x, norm='ortho') along last axis == x @ D.T."""
    n = np.arange(num_filt, dtype=np.float64)[None, :]
    k = np.arange(num_coeffs, dtype=np.float64)[:, None]
    D = 2.0 * np.cos(np.pi * k * (2.0 * n + 1.0) / (2.0 * num_filt))
    D[0, :] *= np.sqrt(1.0 / (4.0 * num_filt))
    D[1:, :] *= np.sqrt(1.0 / (2.0 * num_filt))
    return D  # (num_coeffs, num_filt)


# ----------------------------------------------------------------------------
# Pallas kernel: one time-block of frames -> one time-block of MFCCs.
# ----------------------------------------------------------------------------
def _mfcc_kernel(frames_ref, cos_ref, sin_ref, mel_ref, dct_ref, out_ref, *,
                 fft_size):
    frames = frames_ref[...]                                   # (TB, W_pad)
    re = jnp.dot(frames, cos_ref[...], preferred_element_type=jnp.float32)
    im = jnp.dot(frames, sin_ref[...], preferred_element_type=jnp.float32)
    power = (re * re + im * im) * (1.0 / float(fft_size))      # (TB, B_pad)

    mel_e = jnp.dot(power, mel_ref[...], preferred_element_type=jnp.float32)
    mels = jnp.log(jnp.maximum(mel_e, _EPS))                   # safe_log
    mfcc = jnp.dot(mels, dct_ref[...], preferred_element_type=jnp.float32)

    energy = jnp.log(jnp.maximum(
        jnp.sum(power, axis=-1, keepdims=True), _EPS))         # (TB, 1)
    col = lax.broadcasted_iota(jnp.int32, mfcc.shape, 1)
    out_ref[...] = jnp.where(col == 0, energy, mfcc)           # coeff0 <- logE


# ----------------------------------------------------------------------------
# Wrapper matching MFCC.forward: x (1, N) audio -> (1, num_coeffs, num_frames)
# ----------------------------------------------------------------------------
def mfcc_forward(x, sample_rate, fft_size=400, window_stride=(400, 200),
                 num_filt=40, num_coeffs=40):
    audio = jnp.squeeze(jnp.asarray(x, jnp.float32), axis=0)   # x.squeeze(0)
    window_size, hop = window_stride
    n = audio.shape[0]
    num_frames = (n - window_size) // hop + 1
    # TODO(synk): sonopy's empty-audio fallback (returns a single zero row) is
    # not handled; we require at least one full frame.
    assert num_frames >= 1, "audio shorter than one analysis window"
    n_bins = fft_size // 2 + 1

    # Lane/MXU-aligned padded sizes (last dims multiples of 128, rows of 8).
    W_pad = _round_up(window_size, 128)        # 400 -> 512
    B_pad = _round_up(n_bins, 128)             # 201 -> 256
    M_pad = _round_up(num_filt, 128)           # 40  -> 128
    C_pad = _round_up(num_coeffs, 128)         # 40  -> 128
    TB = 128 if num_frames > 128 else _round_up(num_frames, 8)
    T_pad = _round_up(num_frames, TB)

    # Frame the audio (overlapping windows) — wrapper-level gather.
    idx = (jnp.arange(num_frames, dtype=jnp.int32)[:, None] * hop
           + jnp.arange(window_size, dtype=jnp.int32)[None, :])
    frames = jnp.take(audio, idx, axis=0)
    frames = jnp.pad(frames, ((0, T_pad - num_frames),
                              (0, W_pad - window_size)))

    # Constant matrices, zero-padded so the pad region contributes nothing.
    cos_m, sin_m = _dft_matrices(fft_size)
    filters = _filterbanks(sample_rate, num_filt, n_bins)
    dct_m = _dct_matrix(num_filt, num_coeffs)

    cos_p = np.zeros((W_pad, B_pad), np.float32); cos_p[:window_size, :n_bins] = cos_m
    sin_p = np.zeros((W_pad, B_pad), np.float32); sin_p[:window_size, :n_bins] = sin_m
    mel_p = np.zeros((B_pad, M_pad), np.float32); mel_p[:n_bins, :num_filt] = filters.T
    dct_p = np.zeros((M_pad, C_pad), np.float32); dct_p[:num_filt, :num_coeffs] = dct_m.T

    grid = (T_pad // TB,)
    flops = 2 * T_pad * (2 * W_pad * B_pad + B_pad * M_pad + M_pad * C_pad)
    bytes_accessed = 4 * (T_pad * W_pad + 2 * W_pad * B_pad + B_pad * M_pad
                          + M_pad * C_pad + T_pad * C_pad)

    out = pl.pallas_call(
        functools.partial(_mfcc_kernel, fft_size=fft_size),
        out_shape=jax.ShapeDtypeStruct((T_pad, C_pad), jnp.float32),
        grid_spec=pltpu.PrefetchScalarGridSpec(
            num_scalar_prefetch=0,
            grid=grid,
            in_specs=[
                pl.BlockSpec((TB, W_pad), lambda i: (i, 0)),     # frames
                pl.BlockSpec((W_pad, B_pad), lambda i: (0, 0)),  # DFT cos
                pl.BlockSpec((W_pad, B_pad), lambda i: (0, 0)),  # DFT sin
                pl.BlockSpec((B_pad, M_pad), lambda i: (0, 0)),  # mel filters
                pl.BlockSpec((M_pad, C_pad), lambda i: (0, 0)),  # DCT
            ],
            out_specs=pl.BlockSpec((TB, C_pad), lambda i: (i, 0)),
        ),
        compiler_params=pltpu.CompilerParams(
            dimension_semantics=("parallel",)),
        cost_estimate=pl.CostEstimate(
            flops=flops,
            transcendentals=T_pad * (M_pad + 1),
            bytes_accessed=bytes_accessed),
    )(frames, jnp.asarray(cos_p), jnp.asarray(sin_p),
      jnp.asarray(mel_p), jnp.asarray(dct_p))

    mfccs = out[:num_frames, :num_coeffs]          # (num_frames, num_coeffs)
    return jnp.transpose(mfccs)[None, :, :]        # .transpose(0,1).unsqueeze(0)


# ----------------------------------------------------------------------------
# Pure-numpy reference (sonopy.mfcc_spec) for correctness checking.
# ----------------------------------------------------------------------------
def _reference_forward(x_np, sample_rate, fft_size=400, window_stride=(400, 200),
                       num_filt=40, num_coeffs=40):
    audio = np.asarray(x_np, np.float64).reshape(-1)
    window_size, hop = window_stride
    frames = np.stack([audio[i - window_size:i]
                       for i in range(window_size, len(audio) + 1, hop)])
    fft = np.fft.rfft(frames, n=fft_size)
    powers = (fft.real ** 2 + fft.imag ** 2) / fft_size
    filters = _filterbanks(sample_rate, num_filt, powers.shape[1])
    mels = np.log(np.clip(powers @ filters.T, _EPS, None))
    mfccs = (mels @ _dct_matrix(num_filt, num_coeffs).T)[:, :num_coeffs]
    mfccs[:, 0] = np.log(np.clip(powers.sum(1), _EPS, None))
    return mfccs.T[None, :, :]                     # (1, num_coeffs, num_frames)


if __name__ == "__main__":
    key = jax.random.PRNGKey(0)
    sample_rate = 16000
    num_samples = 4000                             # 0.25 s of audio -> 19 frames
    x = jax.random.normal(key, (1, num_samples), dtype=jnp.float32)

    y = mfcc_forward(x, sample_rate)
    y = jax.block_until_ready(y)

    ref = _reference_forward(np.asarray(x), sample_rate)
    assert y.shape == ref.shape, (y.shape, ref.shape)
    max_err = float(np.max(np.abs(np.asarray(y, np.float64) - ref)))
    assert np.allclose(np.asarray(y, np.float64), ref, rtol=5e-2, atol=5e-2), max_err

    print("KERNEL_OK")
</pallas_src>

<mosaic_0001>
module attributes {stable_mosaic.version = 11 : i64} {
  func.func @_mfcc_kernel(%arg0: i32, %arg1: memref<24x512xf32, #tpu.memory_space<vmem>>, %arg2: memref<512x256xf32, #tpu.memory_space<vmem>>, %arg3: memref<512x256xf32, #tpu.memory_space<vmem>>, %arg4: memref<256x128xf32, #tpu.memory_space<vmem>>, %arg5: memref<128x128xf32, #tpu.memory_space<vmem>>, %arg6: memref<24x128xf32, #tpu.memory_space<vmem>>) attributes {dimension_semantics = [#tpu.dimension_semantics<parallel>], iteration_bounds = array<i64: 1>, scalar_prefetch = 0 : i64, scratch_operands = 0 : i64, tpu.core_type = #tpu.core_type<tc>, window_params = [{transform_indices = @transform_0, window_bounds = array<i64: 24, 512>}, {pipeline_mode = #tpu.pipeline_mode<synchronous>, transform_indices = @transform_1, window_bounds = array<i64: 512, 256>}, {pipeline_mode = #tpu.pipeline_mode<synchronous>, transform_indices = @transform_2, window_bounds = array<i64: 512, 256>}, {pipeline_mode = #tpu.pipeline_mode<synchronous>, transform_indices = @transform_3, window_bounds = array<i64: 256, 128>}, {pipeline_mode = #tpu.pipeline_mode<synchronous>, transform_indices = @transform_4, window_bounds = array<i64: 128, 128>}, {transform_indices = @transform_5, window_bounds = array<i64: 24, 128>}]} {
    %c0 = arith.constant 0 : index
    %c0_0 = arith.constant 0 : index
    %0 = vector.load %arg1[%c0, %c0_0] : memref<24x512xf32, #tpu.memory_space<vmem>>, vector<24x512xf32>
    %c0_1 = arith.constant 0 : index
    %c0_2 = arith.constant 0 : index
    %1 = vector.load %arg2[%c0_1, %c0_2] : memref<512x256xf32, #tpu.memory_space<vmem>>, vector<512x256xf32>
    %cst = arith.constant dense<0.000000e+00> : vector<24x256xf32>
    %2 = tpu.matmul %0, %1, %cst {dimension_numbers = #tpu.dot_dimension_numbers<[1], [0], [0], [1], [0, 0, 1, 1], [], []>} : vector<24x512xf32>, vector<512x256xf32>, vector<24x256xf32> -> vector<24x256xf32>
    %c0_3 = arith.constant 0 : index
    %c0_4 = arith.constant 0 : index
    %3 = vector.load %arg3[%c0_3, %c0_4] : memref<512x256xf32, #tpu.memory_space<vmem>>, vector<512x256xf32>
    %cst_5 = arith.constant dense<0.000000e+00> : vector<24x256xf32>
    %4 = tpu.matmul %0, %3, %cst_5 {dimension_numbers = #tpu.dot_dimension_numbers<[1], [0], [0], [1], [0, 0, 1, 1], [], []>} : vector<24x512xf32>, vector<512x256xf32>, vector<24x256xf32> -> vector<24x256xf32>
    %5 = arith.mulf %2, %2 : vector<24x256xf32>
    %6 = arith.mulf %4, %4 : vector<24x256xf32>
    %7 = arith.addf %5, %6 : vector<24x256xf32>
    %cst_6 = arith.constant 2.500000e-03 : f32
    %8 = vector.broadcast %cst_6 : f32 to vector<24x256xf32>
    %9 = arith.mulf %7, %8 : vector<24x256xf32>
    %c0_7 = arith.constant 0 : index
    %c0_8 = arith.constant 0 : index
    %10 = vector.load %arg4[%c0_7, %c0_8] : memref<256x128xf32, #tpu.memory_space<vmem>>, vector<256x128xf32>
    %cst_9 = arith.constant dense<0.000000e+00> : vector<24x128xf32>
    %11 = tpu.matmul %9, %10, %cst_9 {dimension_numbers = #tpu.dot_dimension_numbers<[1], [0], [0], [1], [0, 0, 1, 1], [], []>} : vector<24x256xf32>, vector<256x128xf32>, vector<24x128xf32> -> vector<24x128xf32>
    %cst_10 = arith.constant 2.22044605E-16 : f32
    %12 = vector.broadcast %cst_10 : f32 to vector<24x128xf32>
    %13 = arith.maximumf %11, %12 : vector<24x128xf32>
    %14 = math.log %13 : vector<24x128xf32>
    %c0_11 = arith.constant 0 : index
    %c0_12 = arith.constant 0 : index
    %15 = vector.load %arg5[%c0_11, %c0_12] : memref<128x128xf32, #tpu.memory_space<vmem>>, vector<128x128xf32>
    %cst_13 = arith.constant dense<0.000000e+00> : vector<24x128xf32>
    %16 = tpu.matmul %14, %15, %cst_13 {dimension_numbers = #tpu.dot_dimension_numbers<[1], [0], [0], [1], [0, 0, 1, 1], [], []>} : vector<24x128xf32>, vector<128x128xf32>, vector<24x128xf32> -> vector<24x128xf32>
    %cst_14 = arith.constant dense<0.000000e+00> : vector<24xf32>
    %17 = vector.multi_reduction <add>, %9, %cst_14 [1] : vector<24x256xf32> to vector<24xf32>
    %18 = vector.shape_cast %17 : vector<24xf32> to vector<24x1xf32>
    %cst_15 = arith.constant 2.22044605E-16 : f32
    %19 = vector.broadcast %cst_15 : f32 to vector<24x1xf32>
    %20 = arith.maximumf %18, %19 : vector<24x1xf32>
    %21 = math.log %20 : vector<24x1xf32>
    %22 = tpu.iota {dimensions = array<i32: 1>} : vector<24x128xi32>
    %c0_i32 = arith.constant 0 : i32
    %23 = vector.broadcast %c0_i32 : i32 to vector<24x128xi32>
    %24 = arith.cmpi eq, %22, %23 : vector<24x128xi32>
    %25 = vector.shape_cast %21 : vector<24x1xf32> to vector<24x1xf32>
    %26 = vector.broadcast %25 : vector<24x1xf32> to vector<24x128xf32>
    %27 = arith.select %24, %26, %16 : vector<24x128xi1>, vector<24x128xf32>
    %c0_16 = arith.constant 0 : index
    %c0_17 = arith.constant 0 : index
    %28 = vector.load %arg6[%c0_16, %c0_17] : memref<24x128xf32, #tpu.memory_space<vmem>>, vector<24x128xf32>
    tpu.vector_store %arg6[%c0_16, %c0_17], %27 {strides = array<i32>} : memref<24x128xf32, #tpu.memory_space<vmem>>, vector<24x128xf32>,
    return
  }
  func.func @transform_0(%arg0: i32) -> (i32, i32) {
    %c0_i32 = arith.constant 0 : i32
    %c0_i32_0 = arith.constant 0 : i32
    return %arg0, %c0_i32 : i32, i32
  }
  func.func @transform_1(%arg0: i32) -> (i32, i32) {
    %c0_i32 = arith.constant 0 : i32
    %c0_i32_0 = arith.constant 0 : i32
    %c0_i32_1 = arith.constant 0 : i32
    return %c0_i32, %c0_i32_0 : i32, i32
  }
  func.func @transform_2(%arg0: i32) -> (i32, i32) {
    %c0_i32 = arith.constant 0 : i32
    %c0_i32_0 = arith.constant 0 : i32
    %c0_i32_1 = arith.constant 0 : i32
    return %c0_i32, %c0_i32_0 : i32, i32
  }
  func.func @transform_3(%arg0: i32) -> (i32, i32) {
    %c0_i32 = arith.constant 0 : i32
    %c0_i32_0 = arith.constant 0 : i32
    %c0_i32_1 = arith.constant 0 : i32
    return %c0_i32, %c0_i32_0 : i32, i32
  }
  func.func @transform_4(%arg0: i32) -> (i32, i32) {
    %c0_i32 = arith.constant 0 : i32
    %c0_i32_0 = arith.constant 0 : i32
    %c0_i32_1 = arith.constant 0 : i32
    return %c0_i32, %c0_i32_0 : i32, i32
  }
  func.func @transform_5(%arg0: i32) -> (i32, i32) {
    %c0_i32 = arith.constant 0 : i32
    %c0_i32_0 = arith.constant 0 : i32
    return %arg0, %c0_i32 : i32, i32
  }
}

</mosaic_0001>

<bundles_post_ra>
// kernel: tpu_custom_call.1
= control target key start
LH: loop header
LB: loop body
LE: loop exit
PB: predicated region body
PF: predicated region fallthrough
CT: control target
= control target key end

     0   :  { %10 = vsyncpa [#allocation3], 0  ;;  %s1706_s0 = inlined_call_operand.hbm [shape: f32[24,512], index: 0, kind: input, shape index: {}]   ;;  %s1707_s1 = inlined_call_operand.hbm [shape: f32[512,256], index: 1, kind: input, shape index: {}]   ;;  %s1708_s2 = inlined_call_operand.hbm [shape: f32[512,256], index: 2, kind: input, shape index: {}]   ;;  %s1709_s3 = inlined_call_operand.hbm [shape: f32[256,128], index: 3, kind: input, shape index: {}]   ;;  %s1710_s4 = inlined_call_operand.hbm [shape: f32[128,128], index: 4, kind: input, shape index: {}]   ;;  %s1711_s5 = inlined_call_operand.hbm [shape: f32[24,128], index: 5, kind: output, shape index: {}]  }
   0x1   :  { %11 = vsyncpa [#allocation6], 0 }
   0x2   :  { %12 = vsyncpa [#allocation9], 0 }
   0x3   :  { %13 = vsyncpa [#allocation4], 0  ;;  %s1568_s18 = smov [#allocation5]   ;;  %s1428_s22 = scalar_lea.hbm %s1707_s1, 16384 }
   0x4   :  { %s31_s19 = sshll.u32 %s1568_s18, 4  ;;  %p1429_p0 = scmp.ne.s32.totalorder %s1707_s1, %s1428_s22  ;;  %s32_s19 = int_to_ptr.vmem [resolvable:$true] %s31_s19 }
   0x5   :  { %p1432_p1 = scmp.lt.u32.totalorder %s1428_s22, %s1707_s1 }
   0x7   :  { %p1434_p2 = pnand %p1432_p1, %p1429_p0 }
   0x9   :  { %1437 = shalt.err (!%p1434_p2)
}
   0xa   :  { %s1438_s27 = scalar_lea.vmem %s32_s19, 16384  ;;  %p1443_p4 = scmp.lt.s32.totalorder %s32_s19, %s32_s19 }
   0xb   :  { %p1439_p3 = scmp.ne.s32.totalorder %s32_s19, %s1438_s27  ;;  %p1444_p5 = scmp.lt.s32.totalorder %s1438_s27, %s1438_s27 }
   0xd   :  { %p1445_p6 = por %p1444_p5, %p1443_p4 }
   0xf   :  { %p1446_p7 = pnand %p1445_p6, %p1439_p3 }
  0x11   :  { %1449 = shalt.err (!%p1446_p7)
}
  0x12   :  { %s1569_s28 = smov 256   ;;  %s1570_s29 = smov 16  }
  0x13   :  { %37 = dma.hbm_to_vmem [thread:$0]  %s1707_s1, 16384, %s32_s19, [#allocation6], %s1569_s28, %s1569_s28, %s1570_s29  }
  0x14   :  { %s1571_s7 = smov [#allocation8]   ;;  %s1450_s11 = scalar_lea.hbm %s1709_s3, 4096 }
  0x15   :  { %s55_s8 = sshll.u32 %s1571_s7, 4  ;;  %p1451_p8 = scmp.ne.s32.totalorder %s1709_s3, %s1450_s11  ;;  %s56_s8 = int_to_ptr.vmem [resolvable:$true] %s55_s8 }
  0x16   :  { %p1454_p9 = scmp.lt.u32.totalorder %s1450_s11, %s1709_s3 }
  0x18   :  { %p1456_p10 = pnand %p1454_p9, %p1451_p8 }
  0x1a   :  { %1459 = shalt.err (!%p1456_p10)
}
  0x1b   :  { %s1460_s16 = scalar_lea.vmem %s56_s8, 4096  ;;  %p1465_p12 = scmp.lt.s32.totalorder %s56_s8, %s56_s8 }
  0x1c   :  { %p1461_p11 = scmp.ne.s32.totalorder %s56_s8, %s1460_s16  ;;  %p1466_p13 = scmp.lt.s32.totalorder %s1460_s16, %s1460_s16 }
  0x1e   :  { %p1467_p0 = por %p1466_p13, %p1465_p12 }
  0x20   :  { %p1468_p1 = pnand %p1467_p0, %p1461_p11 }
  0x22   :  { %1471 = shalt.err (!%p1468_p1)
}
  0x23   :  { %s1572_s1 = smov 128   ;;  %s1573_s17 = smov 8  }
  0x24   :  { %61 = dma.hbm_to_vmem [thread:$0]  %s1709_s3, 4096, %s56_s8, [#allocation9], %s1572_s1, %s1572_s1, %s1573_s17  }
  0x25   :  { %s1574_s20 = smov [#allocation2]   ;;  %s1472_s24 = scalar_lea.hbm %s1706_s0, 1536 }
  0x26   :  { %s19_s21 = sshll.u32 %s1574_s20, 4  ;;  %p1473_p2 = scmp.ne.s32.totalorder %s1706_s0, %s1472_s24  ;;  %s20_s21 = int_to_ptr.vmem [resolvable:$true] %s19_s21 }
  0x27   :  { %p1476_p3 = scmp.lt.u32.totalorder %s1472_s24, %s1706_s0 }
  0x29   :  { %p1478_p4 = pnand %p1476_p3, %p1473_p2 }
  0x2b   :  { %1481 = shalt.err (!%p1478_p4)
}
  0x2c   :  { %s1482_s6 = scalar_lea.vmem %s20_s21, 1536  ;;  %p1487_p6 = scmp.lt.s32.totalorder %s20_s21, %s20_s21 }
  0x2d   :  { %p1483_p5 = scmp.ne.s32.totalorder %s20_s21, %s1482_s6  ;;  %p1488_p7 = scmp.lt.s32.totalorder %s1482_s6, %s1482_s6 }
  0x2f   :  { %p1489_p8 = por %p1488_p7, %p1487_p6 }
  0x31   :  { %p1490_p9 = pnand %p1489_p8, %p1483_p5 }
  0x33   :  { %1493 = shalt.err (!%p1490_p9)
}
  0x34   :  { %s1575_s3 = smov 512   ;;  %s1576_s7 = smov 32  }
  0x35   :  { %25 = dma.hbm_to_vmem [thread:$0]  %s1706_s0, 1536, %s20_s21, [#allocation3], %s1575_s3, %s1575_s3, %s1576_s7  }
  0x36   :  { %s1577_s10 = smov [#allocation7]   ;;  %s1578_s12 = smov [#allocation10]  }
  0x37   :  { %s43_s11 = sshll.u32 %s1577_s10, 4  ;;  %s67_s13 = sshll.u32 %s1578_s12, 4  ;;  %s44_s11 = int_to_ptr.vmem [resolvable:$true] %s43_s11  ;;  %s68_s13 = int_to_ptr.vmem [resolvable:$true] %s67_s13 }
  0x38   :  { %s1494_s16 = scalar_lea.hbm %s1708_s2, 16384 }
  0x39   :  { %p1495_p10 = scmp.ne.s32.totalorder %s1708_s2, %s1494_s16  ;;  %p1498_p11 = scmp.lt.u32.totalorder %s1494_s16, %s1708_s2 }
  0x3b   :  { %p1500_p12 = pnand %p1498_p11, %p1495_p10 }
  0x3d   :  { %1503 = shalt.err (!%p1500_p12)
}
  0x3e   :  { %s1504_s0 = scalar_lea.vmem %s44_s11, 16384  ;;  %p1509_p0 = scmp.lt.s32.totalorder %s44_s11, %s44_s11 }
  0x3f   :  { %p1505_p13 = scmp.ne.s32.totalorder %s44_s11, %s1504_s0  ;;  %p1510_p1 = scmp.lt.s32.totalorder %s1504_s0, %s1504_s0 }
  0x41   :  { %p1511_p2 = por %p1510_p1, %p1509_p0 }
  0x43   :  { %p1512_p3 = pnand %p1511_p2, %p1505_p13 }
  0x45   :  { %1515 = shalt.err (!%p1512_p3)
}
  0x46   :  { %49 = dma.hbm_to_vmem [thread:$0]  %s1708_s2, 16384, %s44_s11, [#allocation6], %s1569_s28, %s1569_s28, %s1570_s29  }
  0x47   :  { %s1516_s26 = scalar_lea.hbm %s1710_s4, 2048 }
  0x48   :  { %p1517_p4 = scmp.ne.s32.totalorder %s1710_s4, %s1516_s26  ;;  %p1520_p5 = scmp.lt.u32.totalorder %s1516_s26, %s1710_s4 }
  0x4a   :  { %p1522_p6 = pnand %p1520_p5, %p1517_p4 }
  0x4c   :  { %1525 = shalt.err (!%p1522_p6)
}
  0x4d   :  { %s1526_s7 = scalar_lea.vmem %s68_s13, 2048  ;;  %p1531_p8 = scmp.lt.s32.totalorder %s68_s13, %s68_s13 }
  0x4e   :  { %p1527_p7 = scmp.ne.s32.totalorder %s68_s13, %s1526_s7  ;;  %p1532_p9 = scmp.lt.s32.totalorder %s1526_s7, %s1526_s7 }
  0x50   :  { %p1533_p10 = por %p1532_p9, %p1531_p8 }
  0x52   :  { %p1534_p11 = pnand %p1533_p10, %p1527_p7 }
  0x54   :  { %1537 = shalt.err (!%p1534_p11)
}
  0x55   :  { %73 = dma.hbm_to_vmem [thread:$0]  %s1710_s4, 2048, %s68_s13, [#allocation9], %s1572_s1, %s1572_s1, %s1573_s17  }
  0x56   :  { %1560 = dma.done.wait [#allocation3], 1536  }
  0x57   :  { %1561 = vsyncadd [#allocation3], 4294965760 }
  0x58   :  { %1562 = dma.done.wait [#allocation6], 32768  }
  0x59   :  { %1563 = vsyncadd [#allocation6], 4294934528 }
  0x5a   :  { %1564 = dma.done.wait [#allocation9], 6144  }
  0x5b   :  { %1565 = vsyncadd [#allocation9], 4294961152  ;;  %v102_v0 = vld [vmem:[#allocation5 + $0x8] sm:$0xff]  ;;  %v104_v1 = vld [vmem:[#allocation5 + $0x18] sm:$0xff]  ;;  %vm1580_vm0 = vmmov 0   ;;  %s1582_s4 = smov [#allocation11]  }
  0x5c   :  { %v396_v2 = vld [vmem:[#allocation7 + $0x8] sm:$0xff]  ;;  %v1077_v3 = vpack.c.bf16 %v104_v1, %v102_v0  ;;  %v398_v4 = vld [vmem:[#allocation7 + $0x18] sm:$0xff]  ;;  %v101_v5 = vld [vmem:[#allocation5] sm:$0xff]  ;;  %s962_s29 = sshll.u32 %s1582_s4, 4  ;;  %s963_s29 = int_to_ptr.vmem [resolvable:$true] %s962_s29 }
  0x5d   :  { %v103_v6 = vld [vmem:[#allocation5 + $0x10] sm:$0xff]  ;;  %v1205_v7 = vpack.c.bf16 %v398_v4, %v396_v2  ;;  %v395_v9 = vld [vmem:[#allocation7] sm:$0xff]  ;;  %v106_v11 = vld [vmem:[#allocation5 + $0x28] sm:$0xff]  ;;  %s1538_s8 = scalar_lea.vmem %s963_s29, 384  ;;  %p1543_p13 = scmp.lt.s32.totalorder %s963_s29, %s963_s29 }
  0x5e   :  { %v1079_v8 = vpack.c.bf16 %v103_v6, %v101_v5  ;;  %v397_v10 = vld [vmem:[#allocation7 + $0x10] sm:$0xff]  ;;  %1078 = vmatprep.subr.bf16.mxu0 %v1077_v3  ;;  %v108_v13 = vld [vmem:[#allocation5 + $0x38] sm:$0xff]  ;;  %v400_v14 = vld [vmem:[#allocation7 + $0x28] sm:$0xff]  ;;  %p1539_p12 = scmp.ne.s32.totalorder %s963_s29, %s1538_s8  ;;  %p1544_p0 = scmp.lt.s32.totalorder %s1538_s8, %s1538_s8 }
  0x5f   :  { %v1207_v12 = vpack.c.bf16 %v397_v10, %v395_v9  ;;  %v402_v15 = vld [vmem:[#allocation7 + $0x38] sm:$0xff]  ;;  %1206 = vmatprep.subr.bf16.mxu1 %v1205_v7  ;;  %v1081_v16 = vpack.c.bf16 %v108_v13, %v106_v11  ;;  %v105_v18 = vld [vmem:[#allocation5 + $0x20] sm:$0xff]  ;;  %v107_v19 = vld [vmem:[#allocation5 + $0x30] sm:$0xff] }
  0x60   :  { %1080 = vmatpush1.bf16.msra.mxu0 %v1079_v8  ;;  %v1209_v17 = vpack.c.bf16 %v402_v15, %v400_v14  ;;  %v399_v20 = vld [vmem:[#allocation7 + $0x20] sm:$0xff]  ;;  %v1083_v21 = vpack.c.bf16 %v107_v19, %v105_v18  ;;  %v401_v22 = vld [vmem:[#allocation7 + $0x30] sm:$0xff]  ;;  %v110_v23 = vld [vmem:[#allocation5 + $0x48] sm:$0xff]  ;;  %p1545_p1 = por %p1544_p0, %p1543_p13 }
  0x61   :  { %1208 = vmatpush1.bf16.msra.mxu1 %v1207_v12  ;;  %v112_v24 = vld [vmem:[#allocation5 + $0x58] sm:$0xff]  ;;  %1082 = vmatprep.subr.bf16.mxu0 %v1081_v16  ;;  %v1211_v25 = vpack.c.bf16 %v401_v22, %v399_v20  ;;  %v404_v27 = vld [vmem:[#allocation7 + $0x48] sm:$0xff]  ;;  %v109_v29 = vld [vmem:[#allocation5 + $0x40] sm:$0xff] }
  0x62   :  { %1210 = vmatprep.subr.bf16.mxu1 %v1209_v17  ;;  %v1085_v26 = vpack.c.bf16 %v112_v24, %v110_v23  ;;  %v406_v28 = vld [vmem:[#allocation7 + $0x58] sm:$0xff]  ;;  %v111_v31 = vld [vmem:[#allocation5 + $0x50] sm:$0xff]  ;;  %v403_v32 = vld [vmem:[#allocation7 + $0x40] sm:$0xff]  ;;  %p1546_p2 = pnand %p1545_p1, %p1539_p12 }
  0x63   :  { %v1213_v30 = vpack.c.bf16 %v406_v28, %v404_v27  ;;  %v405_v33 = vld [vmem:[#allocation7 + $0x50] sm:$0xff]  ;;  %v1087_v34 = vpack.c.bf16 %v111_v31, %v109_v29  ;;  %v114_v35 = vld [vmem:[#allocation5 + $0x68] sm:$0xff]  ;;  %v116_v36 = vld [vmem:[#allocation5 + $0x78] sm:$0xff] }
  0x64   :  { %1084 = vmatpush1.bf16.msra.mxu0 %v1083_v21  ;;  %v408_v37 = vld [vmem:[#allocation7 + $0x68] sm:$0xff]  ;;  %v1215_v38 = vpack.c.bf16 %v405_v33, %v403_v32  ;;  %v1089_v39 = vpack.c.bf16 %v116_v36, %v114_v35  ;;  %v410_v40 = vld [vmem:[#allocation7 + $0x78] sm:$0xff]  ;;  %v113_v41 = vld [vmem:[#allocation5 + $0x60] sm:$0xff] }
  0x65   :  { %1212 = vmatpush1.bf16.msra.mxu1 %v1211_v25  ;;  %1086 = vmatprep.subr.bf16.mxu0 %v1085_v26  ;;  %v115_v42 = vld [vmem:[#allocation5 + $0x70] sm:$0xff]  ;;  %v1217_v43 = vpack.c.bf16 %v410_v40, %v408_v37  ;;  %v407_v44 = vld [vmem:[#allocation7 + $0x60] sm:$0xff]  ;;  %v118_v46 = vld [vmem:[#allocation5 + $0x88] sm:$0xff] }
  0x66   :  { %1214 = vmatprep.subr.bf16.mxu1 %v1213_v30  ;;  %v409_v45 = vld [vmem:[#allocation7 + $0x70] sm:$0xff]  ;;  %v120_v47 = vld [vmem:[#allocation5 + $0x98] sm:$0xff]  ;;  %v412_v48 = vld [vmem:[#allocation7 + $0x88] sm:$0xff]  ;;  %v1091_v50 = vpack.c.bf16 %v115_v42, %v113_v41 }
  0x67   :  { %v414_v49 = vld [vmem:[#allocation7 + $0x98] sm:$0xff]  ;;  %v1219_v51 = vpack.c.bf16 %v409_v45, %v407_v44  ;;  %v1093_v52 = vpack.c.bf16 %v120_v47, %v118_v46  ;;  %v117_v53 = vld [vmem:[#allocation5 + $0x80] sm:$0xff]  ;;  %v119_v54 = vld [vmem:[#allocation5 + $0x90] sm:$0xff] }
  0x68   :  { %1088 = vmatpush1.bf16.msra.mxu0 %v1087_v34  ;;  %v411_v55 = vld [vmem:[#allocation7 + $0x80] sm:$0xff]  ;;  %v1221_v56 = vpack.c.bf16 %v414_v49, %v412_v48  ;;  %v413_v57 = vld [vmem:[#allocation7 + $0x90] sm:$0xff]  ;;  %v122_v58 = vld [vmem:[#allocation5 + $0xa8] sm:$0xff]  ;;  %v1095_v62 = vpack.c.bf16 %v119_v54, %v117_v53 }
  0x69   :  { %1216 = vmatpush1.bf16.msra.mxu1 %v1215_v38  ;;  %1090 = vmatprep.subr.bf16.mxu0 %v1089_v39  ;;  %v124_v59 = vld [vmem:[#allocation5 + $0xb8] sm:$0xff]  ;;  %v416_v60 = vld [vmem:[#allocation7 + $0xa8] sm:$0xff]  ;;  %v1223_v63 = vpack.c.bf16 %v413_v57, %v411_v55  ;;  %v121_v1 = vld [vmem:[#allocation5 + $0xa0] sm:$0xff] }
  0x6a   :  { %1218 = vmatprep.subr.bf16.mxu1 %v1217_v43  ;;  %v418_v61 = vld [vmem:[#allocation7 + $0xb8] sm:$0xff]  ;;  %v1097_v0 = vpack.c.bf16 %v124_v59, %v122_v58  ;;  %v123_v2 = vld [vmem:[#allocation5 + $0xb0] sm:$0xff]  ;;  %v415_v3 = vld [vmem:[#allocation7 + $0xa0] sm:$0xff] }
  0x6b   :  { %v1225_v4 = vpack.c.bf16 %v418_v61, %v416_v60  ;;  %v417_v5 = vld [vmem:[#allocation7 + $0xb0] sm:$0xff]  ;;  %v126_v6 = vld [vmem:[#allocation5 + $0xc8] sm:$0xff]  ;;  %v128_v7 = vld [vmem:[#allocation5 + $0xd8] sm:$0xff]  ;;  %v1099_v10 = vpack.c.bf16 %v123_v2, %v121_v1 }
  0x6c   :  { %1092 = vmatpush1.bf16.msra.mxu0 %v1091_v50  ;;  %v420_v8 = vld [vmem:[#allocation7 + $0xc8] sm:$0xff]  ;;  %v422_v9 = vld [vmem:[#allocation7 + $0xd8] sm:$0xff]  ;;  %v1227_v11 = vpack.c.bf16 %v417_v5, %v415_v3  ;;  %v1101_v12 = vpack.c.bf16 %v128_v7, %v126_v6  ;;  %v125_v13 = vld [vmem:[#allocation5 + $0xc0] sm:$0xff] }
  0x6d   :  { %1220 = vmatpush1.bf16.msra.mxu1 %v1219_v51  ;;  %1094 = vmatprep.subr.bf16.mxu0 %v1093_v52  ;;  %v127_v14 = vld [vmem:[#allocation5 + $0xd0] sm:$0xff]  ;;  %v419_v15 = vld [vmem:[#allocation7 + $0xc0] sm:$0xff]  ;;  %v1229_v16 = vpack.c.bf16 %v422_v9, %v420_v8  ;;  %v130_v18 = vld [vmem:[#allocation5 + $0xe8] sm:$0xff] }
  0x6e   :  { %1222 = vmatprep.subr.bf16.mxu1 %v1221_v56  ;;  %v421_v17 = vld [vmem:[#allocation7 + $0xd0] sm:$0xff]  ;;  %v132_v19 = vld [vmem:[#allocation5 + $0xf8] sm:$0xff]  ;;  %v424_v20 = vld [vmem:[#allocation7 + $0xe8] sm:$0xff]  ;;  %v1103_v22 = vpack.c.bf16 %v127_v14, %v125_v13 }
  0x6f   :  { %v426_v21 = vld [vmem:[#allocation7 + $0xf8] sm:$0xff]  ;;  %v1231_v23 = vpack.c.bf16 %v421_v17, %v419_v15  ;;  %v1105_v24 = vpack.c.bf16 %v132_v19, %v130_v18  ;;  %v129_v25 = vld [vmem:[#allocation5 + $0xe0] sm:$0xff]  ;;  %v131_v26 = vld [vmem:[#allocation5 + $0xf0] sm:$0xff] }
  0x70   :  { %1096 = vmatpush1.bf16.msra.mxu0 %v1095_v62  ;;  %v423_v27 = vld [vmem:[#allocation7 + $0xe0] sm:$0xff]  ;;  %v1233_v28 = vpack.c.bf16 %v426_v21, %v424_v20  ;;  %v425_v29 = vld [vmem:[#allocation7 + $0xf0] sm:$0xff]  ;;  %v134_v30 = vld [vmem:[#allocation5 + $0x108] sm:$0xff]  ;;  %v1107_v34 = vpack.c.bf16 %v131_v26, %v129_v25 }
  0x71   :  { %1224 = vmatpush1.bf16.msra.mxu1 %v1223_v63  ;;  %1098 = vmatprep.subr.bf16.mxu0 %v1097_v0  ;;  %v136_v31 = vld [vmem:[#allocation5 + $0x118] sm:$0xff]  ;;  %v428_v32 = vld [vmem:[#allocation7 + $0x108] sm:$0xff]  ;;  %v1235_v35 = vpack.c.bf16 %v425_v29, %v423_v27  ;;  %v133_v37 = vld [vmem:[#allocation5 + $0x100] sm:$0xff] }
  0x72   :  { %1226 = vmatprep.subr.bf16.mxu1 %v1225_v4  ;;  %v430_v33 = vld [vmem:[#allocation7 + $0x118] sm:$0xff]  ;;  %v1109_v36 = vpack.c.bf16 %v136_v31, %v134_v30  ;;  %v135_v38 = vld [vmem:[#allocation5 + $0x110] sm:$0xff]  ;;  %v427_v39 = vld [vmem:[#allocation7 + $0x100] sm:$0xff] }
  0x73   :  { %v1237_v40 = vpack.c.bf16 %v430_v33, %v428_v32  ;;  %v429_v41 = vld [vmem:[#allocation7 + $0x110] sm:$0xff]  ;;  %v138_v42 = vld [vmem:[#allocation5 + $0x128] sm:$0xff]  ;;  %v140_v43 = vld [vmem:[#allocation5 + $0x138] sm:$0xff]  ;;  %v1111_v46 = vpack.c.bf16 %v135_v38, %v133_v37 }
  0x74   :  { %1100 = vmatpush1.bf16.msra.mxu0 %v1099_v10  ;;  %v432_v44 = vld [vmem:[#allocation7 + $0x128] sm:$0xff]  ;;  %v434_v45 = vld [vmem:[#allocation7 + $0x138] sm:$0xff]  ;;  %v1239_v47 = vpack.c.bf16 %v429_v41, %v427_v39  ;;  %v1113_v48 = vpack.c.bf16 %v140_v43, %v138_v42  ;;  %v137_v49 = vld [vmem:[#allocation5 + $0x120] sm:$0xff] }
  0x75   :  { %1228 = vmatpush1.bf16.msra.mxu1 %v1227_v11  ;;  %1102 = vmatprep.subr.bf16.mxu0 %v1101_v12  ;;  %v139_v50 = vld [vmem:[#allocation5 + $0x130] sm:$0xff]  ;;  %v431_v51 = vld [vmem:[#allocation7 + $0x120] sm:$0xff]  ;;  %v1241_v52 = vpack.c.bf16 %v434_v45, %v432_v44  ;;  %v142_v54 = vld [vmem:[#allocation5 + $0x148] sm:$0xff] }
  0x76   :  { %1230 = vmatprep.subr.bf16.mxu1 %v1229_v16  ;;  %v433_v53 = vld [vmem:[#allocation7 + $0x130] sm:$0xff]  ;;  %v144_v55 = vld [vmem:[#allocation5 + $0x158] sm:$0xff]  ;;  %v436_v56 = vld [vmem:[#allocation7 + $0x148] sm:$0xff]  ;;  %v1115_v58 = vpack.c.bf16 %v139_v50, %v137_v49 }
  0x77   :  { %v438_v57 = vld [vmem:[#allocation7 + $0x158] sm:$0xff]  ;;  %v1243_v59 = vpack.c.bf16 %v433_v53, %v431_v51  ;;  %v1117_v60 = vpack.c.bf16 %v144_v55, %v142_v54  ;;  %v141_v61 = vld [vmem:[#allocation5 + $0x140] sm:$0xff]  ;;  %v143_v62 = vld [vmem:[#allocation5 + $0x150] sm:$0xff] }
  0x78   :  { %1104 = vmatpush1.bf16.msra.mxu0 %v1103_v22  ;;  %v435_v63 = vld [vmem:[#allocation7 + $0x140] sm:$0xff]  ;;  %v1245_v0 = vpack.c.bf16 %v438_v57, %v436_v56  ;;  %v437_v1 = vld [vmem:[#allocation7 + $0x150] sm:$0xff]  ;;  %v146_v2 = vld [vmem:[#allocation5 + $0x168] sm:$0xff]  ;;  %v1119_v6 = vpack.c.bf16 %v143_v62, %v141_v61 }
  0x79   :  { %1232 = vmatpush1.bf16.msra.mxu1 %v1231_v23  ;;  %1106 = vmatprep.subr.bf16.mxu0 %v1105_v24  ;;  %v148_v3 = vld [vmem:[#allocation5 + $0x178] sm:$0xff]  ;;  %v440_v4 = vld [vmem:[#allocation7 + $0x168] sm:$0xff]  ;;  %v145_v7 = vld [vmem:[#allocation5 + $0x160] sm:$0xff]  ;;  %v1247_v8 = vpack.c.bf16 %v437_v1, %v435_v63 }
  0x7a   :  { %1234 = vmatprep.subr.bf16.mxu1 %v1233_v28  ;;  %v442_v5 = vld [vmem:[#allocation7 + $0x178] sm:$0xff]  ;;  %v1121_v9 = vpack.c.bf16 %v148_v3, %v146_v2  ;;  %v147_v10 = vld [vmem:[#allocation5 + $0x170] sm:$0xff]  ;;  %v439_v11 = vld [vmem:[#allocation7 + $0x160] sm:$0xff] }
  0x7b   :  { %v441_v12 = vld [vmem:[#allocation7 + $0x170] sm:$0xff]  ;;  %v1249_v13 = vpack.c.bf16 %v442_v5, %v440_v4  ;;  %v150_v14 = vld [vmem:[#allocation5 + $0x188] sm:$0xff]  ;;  %v152_v15 = vld [vmem:[#allocation5 + $0x198] sm:$0xff]  ;;  %v1123_v19 = vpack.c.bf16 %v147_v10, %v145_v7 }
  0x7c   :  { %1108 = vmatpush1.bf16.msra.mxu0 %v1107_v34  ;;  %v90_v16 = vld [vmem:[#allocation2 + $0x8] sm:$0xff]  ;;  %v446_v18 = vld [vmem:[#allocation7 + $0x198] sm:$0xff]  ;;  %v1251_v20 = vpack.c.bf16 %v441_v12, %v439_v11  ;;  %v1125_v21 = vpack.c.bf16 %v152_v15, %v150_v14  ;;  %v149_v22 = vld [vmem:[#allocation5 + $0x180] sm:$0xff] }
  0x7d   :  { %1236 = vmatpush1.bf16.msra.mxu1 %v1235_v35  ;;  %1110 = vmatprep.subr.bf16.mxu0 %v1109_v36  ;;  %v444_v17 = vld [vmem:[#allocation7 + $0x188] sm:$0xff]  ;;  %v151_v23 = vld [vmem:[#allocation5 + $0x190] sm:$0xff]  ;;  %v443_v24 = vld [vmem:[#allocation7 + $0x180] sm:$0xff] }
  0x7e   :  { %1238 = vmatprep.subr.bf16.mxu1 %v1237_v40  ;;  %293 = vmatprep.mubr.f32.mxu0 %v90_v16  ;;  %v1253_v25 = vpack.c.bf16 %v446_v18, %v444_v17  ;;  %v445_v26 = vld [vmem:[#allocation7 + $0x190] sm:$0xff]  ;;  %v154_v27 = vld [vmem:[#allocation5 + $0x1a8] sm:$0xff]  ;;  %v156_v28 = vld [vmem:[#allocation5 + $0x1b8] sm:$0xff]  ;;  %v1127_v31 = vpack.c.bf16 %v151_v23, %v149_v22 }
  0x7f   :  { %587 = vmatprep.mubr.f32.mxu1 %v90_v16  ;;  %v448_v29 = vld [vmem:[#allocation7 + $0x1a8] sm:$0xff]  ;;  %v450_v30 = vld [vmem:[#allocation7 + $0x1b8] sm:$0xff]  ;;  %v1255_v32 = vpack.c.bf16 %v445_v26, %v443_v24  ;;  %v1129_v33 = vpack.c.bf16 %v156_v28, %v154_v27  ;;  %v153_v34 = vld [vmem:[#allocation5 + $0x1a0] sm:$0xff] }
  0x80   :  { %1112 = vmatpush1.bf16.msra.mxu0 %v1111_v46  ;;  %v155_v35 = vld [vmem:[#allocation5 + $0x1b0] sm:$0xff]  ;;  %v447_v36 = vld [vmem:[#allocation7 + $0x1a0] sm:$0xff]  ;;  %v1257_v37 = vpack.c.bf16 %v450_v30, %v448_v29  ;;  %v158_v39 = vld [vmem:[#allocation5 + $0x1c8] sm:$0xff] }
  0x81   :  { %1240 = vmatpush1.bf16.msra.mxu1 %v1239_v47  ;;  %1114 = vmatprep.subr.bf16.mxu0 %v1113_v48  ;;  %v449_v38 = vld [vmem:[#allocation7 + $0x1b0] sm:$0xff]  ;;  %v160_v40 = vld [vmem:[#allocation5 + $0x1d8] sm:$0xff]  ;;  %v452_v41 = vld [vmem:[#allocation7 + $0x1c8] sm:$0xff]  ;;  %v1131_v43 = vpack.c.bf16 %v155_v35, %v153_v34 }
  0x82   :  { %1242 = vmatprep.subr.bf16.mxu1 %v1241_v52  ;;  %v454_v42 = vld [vmem:[#allocation7 + $0x1d8] sm:$0xff]  ;;  %v1259_v44 = vpack.c.bf16 %v449_v38, %v447_v36  ;;  %v1133_v45 = vpack.c.bf16 %v160_v40, %v158_v39  ;;  %v157_v46 = vld [vmem:[#allocation5 + $0x1c0] sm:$0xff]  ;;  %v159_v47 = vld [vmem:[#allocation5 + $0x1d0] sm:$0xff] }
  0x83   :  { %v451_v48 = vld [vmem:[#allocation7 + $0x1c0] sm:$0xff]  ;;  %v1261_v49 = vpack.c.bf16 %v454_v42, %v452_v41  ;;  %v453_v50 = vld [vmem:[#allocation7 + $0x1d0] sm:$0xff]  ;;  %v162_v51 = vld [vmem:[#allocation5 + $0x1e8] sm:$0xff]  ;;  %v1135_v55 = vpack.c.bf16 %v159_v47, %v157_v46 }
  0x84   :  { %1116 = vmatpush1.bf16.msra.mxu0 %v1115_v58  ;;  %v164_v52 = vld [vmem:[#allocation5 + $0x1f8] sm:$0xff]  ;;  %v456_v53 = vld [vmem:[#allocation7 + $0x1e8] sm:$0xff]  ;;  %v1263_v56 = vpack.c.bf16 %v453_v50, %v451_v48  ;;  %v161_v58 = vld [vmem:[#allocation5 + $0x1e0] sm:$0xff] }
  0x85   :  { %1244 = vmatpush1.bf16.msra.mxu1 %v1243_v59  ;;  %1118 = vmatprep.subr.bf16.mxu0 %v1117_v60  ;;  %v458_v54 = vld [vmem:[#allocation7 + $0x1f8] sm:$0xff]  ;;  %v1137_v57 = vpack.c.bf16 %v164_v52, %v162_v51  ;;  %v163_v59 = vld [vmem:[#allocation5 + $0x1f0] sm:$0xff]  ;;  %v455_v60 = vld [vmem:[#allocation7 + $0x1e0] sm:$0xff] }
  0x86   :  { %1246 = vmatprep.subr.bf16.mxu1 %v1245_v0  ;;  %v1265_v61 = vpack.c.bf16 %v458_v54, %v456_v53  ;;  %v457_v62 = vld [vmem:[#allocation7 + $0x1f0] sm:$0xff]  ;;  %v166_v63 = vld [vmem:[#allocation5 + $0x208] sm:$0xff]  ;;  %v168_v0 = vld [vmem:[#allocation5 + $0x218] sm:$0xff]  ;;  %v1139_v3 = vpack.c.bf16 %v163_v59, %v161_v58 }
  0x87   :  { %v460_v1 = vld [vmem:[#allocation7 + $0x208] sm:$0xff]  ;;  %v462_v2 = vld [vmem:[#allocation7 + $0x218] sm:$0xff]  ;;  %v1267_v4 = vpack.c.bf16 %v457_v62, %v455_v60  ;;  %v1141_v5 = vpack.c.bf16 %v168_v0, %v166_v63  ;;  %v167_v7 = vld [vmem:[#allocation5 + $0x210] sm:$0xff] }
  0x88   :  { %1120 = vmatpush1.bf16.msra.mxu0 %v1119_v6  ;;  %v165_v6 = vld [vmem:[#allocation5 + $0x200] sm:$0xff]  ;;  %v461_v10 = vld [vmem:[#allocation7 + $0x210] sm:$0xff]  ;;  %v170_v11 = vld [vmem:[#allocation5 + $0x228] sm:$0xff] }
  0x89   :  { %1248 = vmatpush1.bf16.msra.mxu1 %v1247_v8  ;;  %1122 = vmatprep.subr.bf16.mxu0 %v1121_v9  ;;  %v459_v8 = vld [vmem:[#allocation7 + $0x200] sm:$0xff]  ;;  %v1269_v9 = vpack.c.bf16 %v462_v2, %v460_v1  ;;  %v172_v12 = vld [vmem:[#allocation5 + $0x238] sm:$0xff]  ;;  %v1143_v16 = vpack.c.bf16 %v167_v7, %v165_v6  ;;  %v465_v23 = vld [vmem:[#allocation7 + $0x230] sm:$0xff] }
  0x8a   :  { %1250 = vmatprep.subr.bf16.mxu1 %v1249_v13  ;;  %v464_v13 = vld [vmem:[#allocation7 + $0x228] sm:$0xff]  ;;  %v466_v14 = vld [vmem:[#allocation7 + $0x238] sm:$0xff]  ;;  %v89_v15 = vld [vmem:[#allocation2] sm:$0xff]  ;;  %v1271_v17 = vpack.c.bf16 %v461_v10, %v459_v8  ;;  %v1145_v18 = vpack.c.bf16 %v172_v12, %v170_v11 }
  0x8b   :  { %v1273_v22 = vpack.c.bf16 %v466_v14, %v464_v13  ;;  %v174_v24 = vld [vmem:[#allocation5 + $0x248] sm:$0xff]  ;;  %v470_v27 = vld [vmem:[#allocation7 + $0x258] sm:$0xff]  ;;  %v469_v35 = vld [vmem:[#allocation7 + $0x250] sm:$0xff] }
  0x8c   :  { %1124 = vmatpush1.bf16.msra.mxu0 %v1123_v19  ;;  %v169_v19 = vld [vmem:[#allocation5 + $0x220] sm:$0xff]  ;;  %v468_v26 = vld [vmem:[#allocation7 + $0x248] sm:$0xff]  ;;  %v474_v39 = vld [vmem:[#allocation7 + $0x278] sm:$0xff] }
  0x8d   :  { %1252 = vmatpush1.bf16.msra.mxu1 %v1251_v20  ;;  %1126 = vmatprep.subr.bf16.mxu0 %v1125_v21  ;;  %v171_v20 = vld [vmem:[#allocation5 + $0x230] sm:$0xff]  ;;  %v463_v21 = vld [vmem:[#allocation7 + $0x220] sm:$0xff]  ;;  %v1277_v34 = vpack.c.bf16 %v470_v27, %v468_v26  ;;  %v178_v36 = vld [vmem:[#allocation5 + $0x268] sm:$0xff] }
  0x8e   :  { %1254 = vmatprep.subr.bf16.mxu1 %v1253_v25  ;;  %v176_v25 = vld [vmem:[#allocation5 + $0x258] sm:$0xff]  ;;  %v1147_v28 = vpack.c.bf16 %v171_v20, %v169_v19  ;;  %v1275_v29 = vpack.c.bf16 %v465_v23, %v463_v21  ;;  %v472_v38 = vld [vmem:[#allocation7 + $0x268] sm:$0xff]  ;;  %v473_v47 = vld [vmem:[#allocation7 + $0x270] sm:$0xff] }
  0x8f   :  { %v1149_v30 = vpack.c.bf16 %v176_v25, %v174_v24  ;;  %v1281_v46 = vpack.c.bf16 %v474_v39, %v472_v38  ;;  %v182_v48 = vld [vmem:[#allocation5 + $0x288] sm:$0xff]  ;;  %v478_v51 = vld [vmem:[#allocation7 + $0x298] sm:$0xff]  ;;  %v477_v59 = vld [vmem:[#allocation7 + $0x290] sm:$0xff] }
  0x90   :  { %1128 = vmatpush1.bf16.msra.mxu0 %v1127_v31  ;;  %v173_v31 = vld [vmem:[#allocation5 + $0x240] sm:$0xff]  ;;  %v476_v50 = vld [vmem:[#allocation7 + $0x288] sm:$0xff]  ;;  %v482_v63 = vld [vmem:[#allocation7 + $0x2b8] sm:$0xff] }
  0x91   :  { %1256 = vmatpush1.bf16.msra.mxu1 %v1255_v32  ;;  %1130 = vmatprep.subr.bf16.mxu0 %v1129_v33  ;;  %v175_v32 = vld [vmem:[#allocation5 + $0x250] sm:$0xff]  ;;  %v467_v33 = vld [vmem:[#allocation7 + $0x240] sm:$0xff]  ;;  %v1285_v58 = vpack.c.bf16 %v478_v51, %v476_v50  ;;  %v186_v60 = vld [vmem:[#allocation5 + $0x2a8] sm:$0xff] }
  0x92   :  { %1258 = vmatprep.subr.bf16.mxu1 %v1257_v37  ;;  %v180_v37 = vld [vmem:[#allocation5 + $0x278] sm:$0xff]  ;;  %v1151_v40 = vpack.c.bf16 %v175_v32, %v173_v31  ;;  %v1279_v41 = vpack.c.bf16 %v469_v35, %v467_v33  ;;  %v480_v62 = vld [vmem:[#allocation7 + $0x2a8] sm:$0xff]  ;;  %v185_v1 = vld [vmem:[#allocation5 + $0x2a0] sm:$0xff] }
  0x93   :  { %v1153_v42 = vpack.c.bf16 %v180_v37, %v178_v36  ;;  %v94_v2 = vld [vmem:[#allocation2 + $0x28] sm:$0xff]  ;;  %v479_v6 = vld [vmem:[#allocation7 + $0x2a0] sm:$0xff]  ;;  %v1289_v8 = vpack.c.bf16 %v482_v63, %v480_v62  ;;  %v192_v11 = vld [vmem:[#allocation5 + $0x2d8] sm:$0xff] }
  0x94   :  { %1132 = vmatpush1.bf16.msra.mxu0 %v1131_v43  ;;  %v177_v43 = vld [vmem:[#allocation5 + $0x260] sm:$0xff]  ;;  %v190_v10 = vld [vmem:[#allocation5 + $0x2c8] sm:$0xff]  ;;  %v486_v13 = vld [vmem:[#allocation7 + $0x2d8] sm:$0xff] }
  0x95   :  { %1260 = vmatpush1.bf16.msra.mxu1 %v1259_v44  ;;  %1134 = vmatprep.subr.bf16.mxu0 %v1133_v45  ;;  %v179_v44 = vld [vmem:[#allocation5 + $0x270] sm:$0xff]  ;;  %v471_v45 = vld [vmem:[#allocation7 + $0x260] sm:$0xff]  ;;  %v484_v12 = vld [vmem:[#allocation7 + $0x2c8] sm:$0xff] }
  0x96   :  { %1262 = vmatprep.subr.bf16.mxu1 %v1261_v49  ;;  %v184_v49 = vld [vmem:[#allocation5 + $0x298] sm:$0xff]  ;;  %v1155_v52 = vpack.c.bf16 %v179_v44, %v177_v43  ;;  %v1283_v53 = vpack.c.bf16 %v473_v47, %v471_v45  ;;  %v93_v7 = vld [vmem:[#allocation2 + $0x20] sm:$0xff]  ;;  %v191_v20 = vld [vmem:[#allocation5 + $0x2d0] sm:$0xff] }
  0x97   :  { %v1157_v54 = vpack.c.bf16 %v184_v49, %v182_v48  ;;  %v189_v19 = vld [vmem:[#allocation5 + $0x2c0] sm:$0xff]  ;;  %v485_v23 = vld [vmem:[#allocation7 + $0x2d0] sm:$0xff]  ;;  %v194_v24 = vld [vmem:[#allocation5 + $0x2e8] sm:$0xff] }
  0x98   :  { %1136 = vmatpush1.bf16.msra.mxu0 %v1135_v55  ;;  %v181_v55 = vld [vmem:[#allocation5 + $0x280] sm:$0xff]  ;;  %v196_v25 = vld [vmem:[#allocation5 + $0x2f8] sm:$0xff]  ;;  %v488_v26 = vld [vmem:[#allocation7 + $0x2e8] sm:$0xff] }
  0x99   :  { %1264 = vmatpush1.bf16.msra.mxu1 %v1263_v56  ;;  %1138 = vmatprep.subr.bf16.mxu0 %v1137_v57  ;;  %v183_v56 = vld [vmem:[#allocation5 + $0x290] sm:$0xff]  ;;  %v475_v57 = vld [vmem:[#allocation7 + $0x280] sm:$0xff]  ;;  %v490_v27 = vld [vmem:[#allocation7 + $0x2f8] sm:$0xff]  ;;  %v1169_v31 = vpack.c.bf16 %v196_v25, %v194_v24 }
  0x9a   :  { %1266 = vmatprep.subr.bf16.mxu1 %v1265_v61  ;;  %v188_v61 = vld [vmem:[#allocation5 + $0x2b8] sm:$0xff]  ;;  %v1159_v0 = vpack.c.bf16 %v183_v56, %v181_v55  ;;  %v483_v21 = vld [vmem:[#allocation7 + $0x2c0] sm:$0xff]  ;;  %v195_v33 = vld [vmem:[#allocation5 + $0x2f0] sm:$0xff]  ;;  %v1297_v35 = vpack.c.bf16 %v490_v27, %v488_v26 }
  0x9b   :  { %v193_v32 = vld [vmem:[#allocation5 + $0x2e0] sm:$0xff]  ;;  %v489_v36 = vld [vmem:[#allocation7 + $0x2f0] sm:$0xff]  ;;  %v198_v37 = vld [vmem:[#allocation5 + $0x308] sm:$0xff] }
  0x9c   :  { %1140 = vmatpush1.bf16.msra.mxu0 %v1139_v3  ;;  %v1287_v3 = vpack.c.bf16 %v477_v59, %v475_v57  ;;  %v200_v38 = vld [vmem:[#allocation5 + $0x318] sm:$0xff]  ;;  %v492_v39 = vld [vmem:[#allocation7 + $0x308] sm:$0xff]  ;;  %v197_v44 = vld [vmem:[#allocation5 + $0x300] sm:$0xff] }
  0x9d   :  { %1268 = vmatpush1.bf16.msra.mxu1 %v1267_v4  ;;  %1142 = vmatprep.subr.bf16.mxu0 %v1141_v5  ;;  %v1161_v4 = vpack.c.bf16 %v188_v61, %v186_v60  ;;  %v187_v5 = vld [vmem:[#allocation5 + $0x2b0] sm:$0xff]  ;;  %v1173_v43 = vpack.c.bf16 %v200_v38, %v198_v37  ;;  %v202_v49 = vld [vmem:[#allocation5 + $0x328] sm:$0xff]  ;;  %v204_v50 = vld [vmem:[#allocation5 + $0x338] sm:$0xff] }
  0x9e   :  { %1270 = vmatprep.subr.bf16.mxu1 %v1269_v9  ;;  %v481_v9 = vld [vmem:[#allocation7 + $0x2b0] sm:$0xff]  ;;  %v1163_v14 = vpack.c.bf16 %v187_v5, %v185_v1  ;;  %v496_v51 = vld [vmem:[#allocation7 + $0x328] sm:$0xff]  ;;  %v1177_v55 = vpack.c.bf16 %v204_v50, %v202_v49  ;;  %v201_v56 = vld [vmem:[#allocation5 + $0x320] sm:$0xff] }
  0x9f   :  { %294 = vmatmul.mubr.f32.vlgmr.msra.gmra.mrb[0].mxu0 %v89_v15  ;;  %v199_v45 = vld [vmem:[#allocation5 + $0x310] sm:$0xff]  ;;  %v206_v61 = vld [vmem:[#allocation5 + $0x348] sm:$0xff]  ;;  %v208_v62 = vld [vmem:[#allocation5 + $0x358] sm:$0xff] }
  0xa0   :  { %1144 = vmatpush1.bf16.msra.mxu0 %v1143_v16  ;;  %588 = vmatmul.mubr.f32.vlgmr.msra.gmra.mrb[0].mxu1 %v89_v15  ;;  %v98_v15 = vld [vmem:[#allocation2 + $0x48] sm:$0xff]  ;;  %v97_v16 = vld [vmem:[#allocation2 + $0x40] sm:$0xff]  ;;  %v493_v48 = vld [vmem:[#allocation7 + $0x310] sm:$0xff] }
  0xa1   :  { %1272 = vmatpush1.bf16.msra.mxu1 %v1271_v17  ;;  %1146 = vmatprep.subr.bf16.mxu0 %v1145_v18  ;;  %v1291_v17 = vpack.c.bf16 %v481_v9, %v479_v6  ;;  %v1165_v18 = vpack.c.bf16 %v192_v11, %v190_v10  ;;  %v203_v57 = vld [vmem:[#allocation5 + $0x330] sm:$0xff]  ;;  %v500_v63 = vld [vmem:[#allocation7 + $0x348] sm:$0xff]  ;;  %v499_v6 = vld [vmem:[#allocation7 + $0x340] sm:$0xff] }
  0xa2   :  { %1274 = vmatprep.subr.bf16.mxu1 %v1273_v22  ;;  %299 = vmatprep.mubr.f32.mxu0 %v94_v2  ;;  %v1293_v22 = vpack.c.bf16 %v486_v13, %v484_v12  ;;  %v497_v60 = vld [vmem:[#allocation7 + $0x330] sm:$0xff]  ;;  %v1179_v1 = vpack.c.bf16 %v203_v57, %v201_v56  ;;  %v210_v9 = vld [vmem:[#allocation5 + $0x368] sm:$0xff]  ;;  %v212_v10 = vld [vmem:[#allocation5 + $0x378] sm:$0xff] }
  0xa3   :  { %593 = vmatprep.mubr.f32.mxu1 %v94_v2  ;;  %300 = vmatmul.mubr.f32.gmra.mrb[2].mxu0 %v93_v7  ;;  %v207_v5 = vld [vmem:[#allocation5 + $0x350] sm:$0xff]  ;;  %v504_v11 = vld [vmem:[#allocation7 + $0x368] sm:$0xff]  ;;  %v506_v12 = vld [vmem:[#allocation7 + $0x378] sm:$0xff] }
  0xa4   :  { %1148 = vmatpush1.bf16.msra.mxu0 %v1147_v28  ;;  %594 = vmatmul.mubr.f32.gmra.mrb[2].mxu1 %v93_v7  ;;  %v92_v28 = vld [vmem:[#allocation2 + $0x18] sm:$0xff]  ;;  %v517_v56 = vld [vmem:[#allocation7 + $0x3d0] sm:$0xff]  ;;  %v226_v57 = vld [vmem:[#allocation5 + $0x3e8] sm:$0xff] }
  0xa5   :  { %1276 = vmatpush1.bf16.msra.mxu1 %v1275_v29  ;;  %1150 = vmatprep.subr.bf16.mxu0 %v1149_v30  ;;  %v1167_v29 = vpack.c.bf16 %v191_v20, %v189_v19  ;;  %v1295_v30 = vpack.c.bf16 %v485_v23, %v483_v21  ;;  %v1313_v19 = vpack.c.bf16 %v506_v12, %v504_v11  ;;  %v505_v20 = vld [vmem:[#allocation7 + $0x370] sm:$0xff]  ;;  %v214_v21 = vld [vmem:[#allocation5 + $0x388] sm:$0xff]  ;;  %v510_v24 = vld [vmem:[#allocation7 + $0x398] sm:$0xff] }
  0xa6   :  { %1278 = vmatprep.subr.bf16.mxu1 %v1277_v34  ;;  %305 = vmatprep.mubr.f32.mxu0 %v98_v15  ;;  %v487_v34 = vld [vmem:[#allocation7 + $0x2e0] sm:$0xff]  ;;  %v508_v23 = vld [vmem:[#allocation7 + $0x388] sm:$0xff]  ;;  %v731_v12 = vld [vmem:[#allocation8 + $0x90] sm:$0xff] }
  0xa7   :  { %599 = vmatprep.mubr.f32.mxu1 %v98_v15  ;;  %306 = vmatmul.mubr.f32.gmra.mrb[4].mxu0 %v97_v16  ;;  %v1185_v15 = vpack.c.bf16 %v212_v10, %v210_v9  ;;  %v713_v10 = vld [vmem:[#allocation8] sm:$0xff]  ;;  %v714_v11 = vld [vmem:[#allocation8 + $0x8] sm:$0xff] }
  0xa8   :  { %1152 = vmatpush1.bf16.msra.mxu0 %v1151_v40  ;;  %600 = vmatmul.mubr.f32.gmra.mrb[4].mxu1 %v97_v16  ;;  %v494_v40 = vld [vmem:[#allocation7 + $0x318] sm:$0xff]  ;;  %v209_v16 = vld [vmem:[#allocation5 + $0x360] sm:$0xff] }
  0xa9   :  { %1280 = vmatpush1.bf16.msra.mxu1 %v1279_v41  ;;  %1154 = vmatprep.subr.bf16.mxu0 %v1153_v42  ;;  %v1171_v41 = vpack.c.bf16 %v195_v33, %v193_v32  ;;  %v1299_v42 = vpack.c.bf16 %v489_v36, %v487_v34  ;;  %v1301_v47 = vpack.c.bf16 %v494_v40, %v492_v39  ;;  %v509_v32 = vld [vmem:[#allocation7 + $0x390] sm:$0xff]  ;;  %v218_v33 = vld [vmem:[#allocation5 + $0x3a8] sm:$0xff]  ;;  %v220_v34 = vld [vmem:[#allocation5 + $0x3b8] sm:$0xff] }
  0xaa   :  { %1282 = vmatprep.subr.bf16.mxu1 %v1281_v46  ;;  %376 = vmatprep.mubr.f32.mxu0 %v92_v28  ;;  %v491_v46 = vld [vmem:[#allocation7 + $0x300] sm:$0xff]  ;;  %v514_v36 = vld [vmem:[#allocation7 + $0x3b8] sm:$0xff]  ;;  %v1193_v39 = vpack.c.bf16 %v220_v34, %v218_v33  ;;  %v719_v33 = vld [vmem:[#allocation8 + $0x30] sm:$0xff] }
  0xab   :  { %670 = vmatprep.mubr.f32.mxu1 %v92_v28  ;;  %v213_v28 = vld [vmem:[#allocation5 + $0x380] sm:$0xff]  ;;  %v720_v34 = vld [vmem:[#allocation8 + $0x38] sm:$0xff] }
  0xac   :  { %1156 = vmatpush1.bf16.msra.mxu0 %v1155_v52  ;;  %v498_v52 = vld [vmem:[#allocation7 + $0x338] sm:$0xff]  ;;  %v217_v40 = vld [vmem:[#allocation5 + $0x3a0] sm:$0xff] }
  0xad   :  { %1284 = vmatpush1.bf16.msra.mxu1 %v1283_v53  ;;  %1158 = vmatprep.subr.bf16.mxu0 %v1157_v54  ;;  %v1175_v53 = vpack.c.bf16 %v199_v45, %v197_v44  ;;  %v1303_v54 = vpack.c.bf16 %v493_v48, %v491_v46  ;;  %v1305_v59 = vpack.c.bf16 %v498_v52, %v496_v51  ;;  %v513_v44 = vld [vmem:[#allocation7 + $0x3b0] sm:$0xff]  ;;  %v222_v45 = vld [vmem:[#allocation5 + $0x3c8] sm:$0xff]  ;;  %v224_v46 = vld [vmem:[#allocation5 + $0x3d8] sm:$0xff] }
  0xae   :  { %1286 = vmatprep.subr.bf16.mxu1 %v1285_v58  ;;  %v495_v58 = vld [vmem:[#allocation7 + $0x320] sm:$0xff]  ;;  %v518_v48 = vld [vmem:[#allocation7 + $0x3d8] sm:$0xff]  ;;  %v1197_v51 = vpack.c.bf16 %v224_v46, %v222_v45  ;;  %v723_v45 = vld [vmem:[#allocation8 + $0x50] sm:$0xff] }
  0xaf   :  { %v1307_v2 = vpack.c.bf16 %v497_v60, %v495_v58  ;;  %v221_v52 = vld [vmem:[#allocation5 + $0x3c0] sm:$0xff]  ;;  %v228_v58 = vld [vmem:[#allocation5 + $0x3f8] sm:$0xff] }
  0xb0   :  { %1160 = vmatpush1.bf16.msra.mxu0 %v1159_v0  ;;  %v502_v0 = vld [vmem:[#allocation7 + $0x358] sm:$0xff] }
  0xb1   :  { %1288 = vmatpush1.bf16.msra.mxu1 %v1287_v3  ;;  %1162 = vmatprep.subr.bf16.mxu0 %v1161_v4  ;;  %v1181_v3 = vpack.c.bf16 %v208_v62, %v206_v61  ;;  %v205_v4 = vld [vmem:[#allocation5 + $0x340] sm:$0xff]  ;;  %v1309_v7 = vpack.c.bf16 %v502_v0, %v500_v63  ;;  %v522_v60 = vld [vmem:[#allocation7 + $0x3f8] sm:$0xff]  ;;  %v1201_v63 = vpack.c.bf16 %v228_v58, %v226_v57  ;;  %v727_v57 = vld [vmem:[#allocation8 + $0x70] sm:$0xff] }
  0xb2   :  { %1290 = vmatprep.subr.bf16.mxu1 %v1289_v8  ;;  %v501_v8 = vld [vmem:[#allocation7 + $0x350] sm:$0xff]  ;;  %v1183_v13 = vpack.c.bf16 %v207_v5, %v205_v4  ;;  %v225_v0 = vld [vmem:[#allocation5 + $0x3e0] sm:$0xff]  ;;  %v724_v46 = vld [vmem:[#allocation8 + $0x58] sm:$0xff] }
  0xb3   :  { %v521_v4 = vld [vmem:[#allocation7 + $0x3f0] sm:$0xff]  ;;  %v729_v5 = vld [vmem:[#allocation8 + $0x80] sm:$0xff]  ;;  %v728_v58 = vld [vmem:[#allocation8 + $0x78] sm:$0xff] }
  0xb4   :  { %1164 = vmatpush1.bf16.msra.mxu0 %v1163_v14  ;;  %v1311_v14 = vpack.c.bf16 %v501_v8, %v499_v6  ;;  %v730_v6 = vld [vmem:[#allocation8 + $0x88] sm:$0xff] }
  0xb5   :  { %1292 = vmatpush1.bf16.msra.mxu1 %v1291_v17  ;;  %1166 = vmatprep.subr.bf16.mxu0 %v1165_v18  ;;  %v211_v17 = vld [vmem:[#allocation5 + $0x370] sm:$0xff]  ;;  %v503_v18 = vld [vmem:[#allocation7 + $0x360] sm:$0xff]  ;;  %v1333_v9 = vpack.c.bf16 %v730_v6, %v729_v5 }
  0xb6   :  { %1294 = vmatprep.subr.bf16.mxu1 %v1293_v22  ;;  %v216_v22 = vld [vmem:[#allocation5 + $0x398] sm:$0xff]  ;;  %v1187_v25 = vpack.c.bf16 %v211_v17, %v209_v16  ;;  %v1315_v26 = vpack.c.bf16 %v505_v20, %v503_v18  ;;  %v1335_v16 = vpack.c.bf16 %v714_v11, %v713_v10  ;;  %v715_v18 = vld [vmem:[#allocation8 + $0x10] sm:$0xff]  ;;  %v733_v20 = vld [vmem:[#allocation8 + $0xa0] sm:$0xff] }
  0xb7   :  { %v1189_v27 = vpack.c.bf16 %v216_v22, %v214_v21  ;;  %v734_v21 = vld [vmem:[#allocation8 + $0xa8] sm:$0xff]  ;;  %v95_v22 = vld [vmem:[#allocation2 + $0x30] sm:$0xff] }
  0xb8   :  { %1168 = vmatpush1.bf16.msra.mxu0 %v1167_v29  ;;  %v215_v29 = vld [vmem:[#allocation5 + $0x390] sm:$0xff] }
  0xb9   :  { %1296 = vmatpush1.bf16.msra.mxu1 %v1295_v30  ;;  %1170 = vmatprep.subr.bf16.mxu0 %v1169_v31  ;;  %v507_v30 = vld [vmem:[#allocation7 + $0x380] sm:$0xff]  ;;  %v1317_v31 = vpack.c.bf16 %v510_v24, %v508_v23  ;;  %v1191_v37 = vpack.c.bf16 %v215_v29, %v213_v28  ;;  %v100_v23 = vld [vmem:[#allocation2 + $0x58] sm:$0xff]  ;;  %v735_v28 = vld [vmem:[#allocation8 + $0xb0] sm:$0xff] }
  0xba   :  { %1298 = vmatprep.subr.bf16.mxu1 %v1297_v35  ;;  %v512_v35 = vld [vmem:[#allocation7 + $0x3a8] sm:$0xff]  ;;  %v1319_v38 = vpack.c.bf16 %v509_v32, %v507_v30  ;;  %v736_v29 = vld [vmem:[#allocation8 + $0xb8] sm:$0xff]  ;;  %v99_v30 = vld [vmem:[#allocation2 + $0x50] sm:$0xff] }
  0xbb   :  { %v1345_v32 = vpack.c.bf16 %v736_v29, %v735_v28 }
  0xbc   :  { %1172 = vmatpush1.bf16.msra.mxu0 %v1171_v41  ;;  %v219_v41 = vld [vmem:[#allocation5 + $0x3b0] sm:$0xff] }
  0xbd   :  { %1300 = vmatpush1.bf16.msra.mxu1 %v1299_v42  ;;  %1174 = vmatprep.subr.bf16.mxu0 %v1173_v43  ;;  %v511_v42 = vld [vmem:[#allocation7 + $0x3a0] sm:$0xff]  ;;  %v1321_v43 = vpack.c.bf16 %v514_v36, %v512_v35  ;;  %v1195_v49 = vpack.c.bf16 %v219_v41, %v217_v40  ;;  %v738_v36 = vld [vmem:[#allocation8 + $0xc8] sm:$0xff]  ;;  %v739_v41 = vld [vmem:[#allocation8 + $0xd0] sm:$0xff] }
  0xbe   :  { %1302 = vmatprep.subr.bf16.mxu1 %v1301_v47  ;;  %v516_v47 = vld [vmem:[#allocation7 + $0x3c8] sm:$0xff]  ;;  %v1323_v50 = vpack.c.bf16 %v513_v44, %v511_v42  ;;  %v737_v35 = vld [vmem:[#allocation8 + $0xc0] sm:$0xff]  ;;  %v740_v42 = vld [vmem:[#allocation8 + $0xd8] sm:$0xff] }
  0xbf   :  { %v722_v40 = vld [vmem:[#allocation8 + $0x48] sm:$0xff]  ;;  %v1353_v44 = vpack.c.bf16 %v740_v42, %v739_v41  ;;  %v838_v42 = vld [vmem:[#allocation10 + $0x20] sm:$0xff] }
  0xc0   :  { %1176 = vmatpush1.bf16.msra.mxu0 %v1175_v53  ;;  %v223_v53 = vld [vmem:[#allocation5 + $0x3d0] sm:$0xff] }
  0xc1   :  { %1304 = vmatpush1.bf16.msra.mxu1 %v1303_v54  ;;  %1178 = vmatprep.subr.bf16.mxu0 %v1177_v55  ;;  %v515_v54 = vld [vmem:[#allocation7 + $0x3c0] sm:$0xff]  ;;  %v1325_v55 = vpack.c.bf16 %v518_v48, %v516_v47  ;;  %v1199_v61 = vpack.c.bf16 %v223_v53, %v221_v52  ;;  %v1355_v47 = vpack.c.bf16 %v724_v46, %v723_v45  ;;  %v726_v52 = vld [vmem:[#allocation8 + $0x68] sm:$0xff]  ;;  %v840_v45 = vld [vmem:[#allocation10 + $0x30] sm:$0xff] }
  0xc2   :  { %1306 = vmatprep.subr.bf16.mxu1 %v1305_v59  ;;  %v520_v59 = vld [vmem:[#allocation7 + $0x3e8] sm:$0xff]  ;;  %v1327_v62 = vpack.c.bf16 %v517_v56, %v515_v54  ;;  %v741_v48 = vld [vmem:[#allocation8 + $0xe0] sm:$0xff]  ;;  %v743_v54 = vld [vmem:[#allocation8 + $0xf0] sm:$0xff] }
  0xc3   :  { %v841_v46 = vld [vmem:[#allocation10 + $0x38] sm:$0xff] }
  0xc4   :  { %1180 = vmatpush1.bf16.msra.mxu0 %v1179_v1  ;;  %v227_v1 = vld [vmem:[#allocation5 + $0x3f0] sm:$0xff] }
  0xc5   :  { %1308 = vmatpush1.bf16.msra.mxu1 %v1307_v2  ;;  %1182 = vmatprep.subr.bf16.mxu0 %v1181_v3  ;;  %v519_v2 = vld [vmem:[#allocation7 + $0x3e0] sm:$0xff]  ;;  %v1329_v3 = vpack.c.bf16 %v522_v60, %v520_v59  ;;  %v1363_v59 = vpack.c.bf16 %v728_v58, %v727_v57  ;;  %v848_v57 = vld [vmem:[#allocation10 + $0x70] sm:$0xff]  ;;  %v849_v58 = vld [vmem:[#allocation10 + $0x78] sm:$0xff] }
  0xc6   :  { %1310 = vmatprep.subr.bf16.mxu1 %v1309_v7  ;;  %v1203_v7 = vpack.c.bf16 %v227_v1, %v225_v0  ;;  %v1331_v8 = vpack.c.bf16 %v521_v4, %v519_v2 }
  0xc8   :  { %1184 = vmatpush1.bf16.msra.mxu0 %v1183_v13  ;;  %v732_v13 = vld [vmem:[#allocation8 + $0x98] sm:$0xff] }
  0xc9   :  { %1312 = vmatpush1.bf16.msra.mxu1 %v1311_v14  ;;  %1186 = vmatprep.subr.bf16.mxu0 %v1185_v15  ;;  %v91_v14 = vld [vmem:[#allocation2 + $0x10] sm:$0xff]  ;;  %v96_v15 = vld [vmem:[#allocation2 + $0x38] sm:$0xff]  ;;  %v1337_v17 = vpack.c.bf16 %v732_v13, %v731_v12 }
  0xca   :  { %1314 = vmatprep.subr.bf16.mxu1 %v1313_v19  ;;  %v716_v19 = vld [vmem:[#allocation8 + $0x18] sm:$0xff] }
  0xcb   :  { %v1339_v24 = vpack.c.bf16 %v716_v19, %v715_v18 }
  0xcc   :  { %1188 = vmatpush1.bf16.msra.mxu0 %v1187_v25  ;;  %v1341_v25 = vpack.c.bf16 %v734_v21, %v733_v20 }
  0xcd   :  { %1316 = vmatpush1.bf16.msra.mxu1 %v1315_v26  ;;  %1190 = vmatprep.subr.bf16.mxu0 %v1189_v27  ;;  %v717_v26 = vld [vmem:[#allocation8 + $0x20] sm:$0xff]  ;;  %v718_v27 = vld [vmem:[#allocation8 + $0x28] sm:$0xff] }
  0xce   :  { %1318 = vmatprep.subr.bf16.mxu1 %v1317_v31  ;;  %v1343_v31 = vpack.c.bf16 %v718_v27, %v717_v26 }
  0xd0   :  { %1192 = vmatpush1.bf16.msra.mxu0 %v1191_v37  ;;  %v1347_v37 = vpack.c.bf16 %v720_v34, %v719_v33 }
  0xd1   :  { %1320 = vmatpush1.bf16.msra.mxu1 %v1319_v38  ;;  %1194 = vmatprep.subr.bf16.mxu0 %v1193_v39  ;;  %v1349_v38 = vpack.c.bf16 %v738_v36, %v737_v35  ;;  %v721_v39 = vld [vmem:[#allocation8 + $0x40] sm:$0xff]  ;;  %v835_v36 = vld [vmem:[#allocation10 + $0x8] sm:$0xff] }
  0xd2   :  { %1322 = vmatprep.subr.bf16.mxu1 %v1321_v43  ;;  %v1351_v43 = vpack.c.bf16 %v722_v40, %v721_v39  ;;  %v834_v35 = vld [vmem:[#allocation10] sm:$0xff]  ;;  %v837_v40 = vld [vmem:[#allocation10 + $0x18] sm:$0xff] }
  0xd3   :  { %v1366_v39 = vpack.c.bf16 %v835_v36, %v834_v35 }
  0xd4   :  { %1196 = vmatpush1.bf16.msra.mxu0 %v1195_v49  ;;  %v742_v49 = vld [vmem:[#allocation8 + $0xe8] sm:$0xff] }
  0xd5   :  { %1324 = vmatpush1.bf16.msra.mxu1 %v1323_v50  ;;  %1198 = vmatprep.subr.bf16.mxu0 %v1197_v51  ;;  %v1357_v50 = vpack.c.bf16 %v742_v49, %v741_v48  ;;  %v725_v51 = vld [vmem:[#allocation8 + $0x60] sm:$0xff]  ;;  %v843_v49 = vld [vmem:[#allocation10 + $0x48] sm:$0xff] }
  0xd6   :  { %1326 = vmatprep.subr.bf16.mxu1 %v1325_v55  ;;  %v1359_v53 = vpack.c.bf16 %v726_v52, %v725_v51  ;;  %v744_v55 = vld [vmem:[#allocation8 + $0xf8] sm:$0xff]  ;;  %v842_v48 = vld [vmem:[#allocation10 + $0x40] sm:$0xff]  ;;  %v844_v51 = vld [vmem:[#allocation10 + $0x50] sm:$0xff] }
  0xd7   :  { %v1361_v56 = vpack.c.bf16 %v744_v55, %v743_v54  ;;  %v845_v52 = vld [vmem:[#allocation10 + $0x58] sm:$0xff]  ;;  %v846_v54 = vld [vmem:[#allocation10 + $0x60] sm:$0xff]  ;;  %v847_v55 = vld [vmem:[#allocation10 + $0x68] sm:$0xff] }
  0xd8   :  { %1200 = vmatpush1.bf16.msra.mxu0 %v1199_v61 }
  0xd9   :  { %1328 = vmatpush1.bf16.msra.mxu1 %v1327_v62  ;;  %1202 = vmatprep.subr.bf16.mxu0 %v1201_v63 }
  0xda   :  { %1330 = vmatprep.subr.bf16.mxu1 %v1329_v3 }
  0xdc   :  { %1204 = vmatpush1.bf16.msra.mxu0 %v1203_v7 }
  0xdd   :  { %1332 = vmatpush1.bf16.msra.mxu1 %v1331_v8  ;;  %1334 = vmatprep.subr.bf16.mxu0 %v1333_v9 }
  0xdf   :  { %377 = vmatmul.mubr.f32.vlgmr.msra.gmra.mrb[0].mxu0 %v91_v14 }
  0xe0   :  { %671 = vmatmul.mubr.f32.vlgmr.msra.gmra.mrb[0].mxu1 %v91_v14  ;;  %382 = vmatprep.mubr.f32.mxu0 %v96_v15 }
  0xe1   :  { %676 = vmatprep.mubr.f32.mxu1 %v96_v15  ;;  %1336 = vmatpush3.bf16.msra.mxu0 %v1335_v16 }
  0xe2   :  { %1338 = vmatprep.subr.bf16.mxu0 %v1337_v17 }
  0xe3   :  { %383 = vmatmul.mubr.f32.gmra.mrb[2].mxu0 %v95_v22 }
  0xe4   :  { %677 = vmatmul.mubr.f32.gmra.mrb[2].mxu1 %v95_v22  ;;  %388 = vmatprep.mubr.f32.mxu0 %v100_v23 }
  0xe5   :  { %682 = vmatprep.mubr.f32.mxu1 %v100_v23  ;;  %1340 = vmatpush3.bf16.msra.mxu0 %v1339_v24 }
  0xe6   :  { %1342 = vmatprep.subr.bf16.mxu0 %v1341_v25 }
  0xe7   :  { %389 = vmatmul.mubr.f32.gmra.mrb[4].mxu0 %v99_v30 }
  0xe8   :  { %683 = vmatmul.mubr.f32.gmra.mrb[4].mxu1 %v99_v30 }
  0xe9   :  { %1344 = vmatpush3.bf16.msra.mxu0 %v1343_v31 }
  0xea   :  { %1346 = vmatprep.subr.bf16.mxu0 %v1345_v32 }
  0xed   :  { %1348 = vmatpush3.bf16.msra.mxu0 %v1347_v37  ;;  %v836_v37 = vld [vmem:[#allocation10 + $0x10] sm:$0xff] }
  0xee   :  { %1350 = vmatprep.subr.bf16.mxu0 %v1349_v38  ;;  %v1579_v38 = vmov 0.0|0.0   ;;  %v1369_v41 = vpack.c.bf16 %v837_v40, %v836_v37 }
  0xef   :  { %1365 = vmatprep.subr.bf16.mxu1 %v1579_v38 }
  0xf0   :  { %1367 = vmatpush3.bf16.msra.mxu1 %v1366_v39 }
  0xf1   :  { %1352 = vmatpush3.bf16.msra.mxu0 %v1351_v43  ;;  %1368 = vmatprep.subr.bf16.mxu1 %v1579_v38  ;;  %v839_v43 = vld [vmem:[#allocation10 + $0x28] sm:$0xff] }
  0xf2   :  { %1354 = vmatprep.subr.bf16.mxu0 %v1353_v44  ;;  %v1372_v44 = vpack.c.bf16 %v839_v43, %v838_v42 }
  0xf4   :  { %1370 = vmatpush3.bf16.msra.mxu1 %v1369_v41 }
  0xf5   :  { %1356 = vmatpush3.bf16.msra.mxu0 %v1355_v47  ;;  %1371 = vmatprep.subr.bf16.mxu1 %v1579_v38  ;;  %v1375_v47 = vpack.c.bf16 %v841_v46, %v840_v45 }
  0xf6   :  { %1358 = vmatprep.subr.bf16.mxu0 %v1357_v50  ;;  %v1378_v50 = vpack.c.bf16 %v843_v49, %v842_v48 }
  0xf8   :  { %1373 = vmatpush3.bf16.msra.mxu1 %v1372_v44 }
  0xf9   :  { %1360 = vmatpush3.bf16.msra.mxu0 %v1359_v53  ;;  %1374 = vmatprep.subr.bf16.mxu1 %v1579_v38  ;;  %v1381_v53 = vpack.c.bf16 %v845_v52, %v844_v51 }
  0xfa   :  { %1362 = vmatprep.subr.bf16.mxu0 %v1361_v56  ;;  %v1384_v56 = vpack.c.bf16 %v847_v55, %v846_v54 }
  0xfc   :  { %1376 = vmatpush3.bf16.msra.mxu1 %v1375_v47 }
  0xfd   :  { %1364 = vmatpush3.bf16.msra.mxu0 %v1363_v59  ;;  %1377 = vmatprep.subr.bf16.mxu1 %v1579_v38  ;;  %v1387_v59 = vpack.c.bf16 %v849_v58, %v848_v57 }
 0x100   :  { %1379 = vmatpush3.bf16.msra.mxu1 %v1378_v50 }
 0x101   :  { %1380 = vmatprep.subr.bf16.mxu1 %v1579_v38 }
 0x104   :  { %1382 = vmatpush3.bf16.msra.mxu1 %v1381_v53 }
 0x105   :  { %1383 = vmatprep.subr.bf16.mxu1 %v1579_v38 }
 0x108   :  { %1385 = vmatpush3.bf16.msra.mxu1 %v1384_v56 }
 0x109   :  { %1386 = vmatprep.subr.bf16.mxu1 %v1579_v38 }
 0x10c   :  { %1388 = vmatpush3.bf16.msra.mxu1 %v1387_v59 }
 0x1b2   :  { %v378_v60 = vpop.f32.mrb[0].mxu0 }
 0x1b3   :  { %v689_v61 = vmul.f32 %v378_v60, %v378_v60  ;;  %v672_v62 = vpop.f32.mrb[0].mxu1  ;;  %v380_v63 = vpop.f32.mrb[1].mxu0  ;;  %v1581_v60 = vmov 0.0  }
 0x1b4   :  { %v695_v0 = vmul.f32 %v672_v62, %v672_v62  ;;  %v690_v1 = vmul.f32 %v380_v63, %v380_v63  ;;  %v674_v2 = vpop.f32.mrb[1].mxu1  ;;  %1068 = vmatprep.mubr.msk.f32.mxu1 %vm1580_vm0, %v1581_v60 }
 0x1b5   :  { %v696_v3 = vmul.f32 %v674_v2, %v674_v2 }
 0x1b6   :  { %v701_v4 = vadd.f32 %v695_v0, %v689_v61  ;;  %v384_v5 = vpop.f32.mrb[2].mxu0 }
 0x1b7   :  { %v702_v6 = vadd.f32 %v696_v3, %v690_v1  ;;  %v691_v7 = vmul.f32 %v384_v5, %v384_v5  ;;  %v678_v8 = vpop.f32.mrb[2].mxu1  ;;  %v386_v9 = vpop.f32.mrb[3].mxu0 }
 0x1b8   :  { %v707_v10 = vmul.f32 0.0025, %v701_v4  ;;  %v697_v11 = vmul.f32 %v678_v8, %v678_v8  ;;  %v692_v12 = vmul.f32 %v386_v9, %v386_v9  ;;  %v680_v13 = vpop.f32.mrb[3].mxu1 }
 0x1b9   :  { %v708_v14 = vmul.f32 0.0025, %v702_v6  ;;  %v698_v15 = vmul.f32 %v680_v13, %v680_v13 }
 0x1ba   :  { %v703_v16 = vadd.f32 %v697_v11, %v691_v7  ;;  %v390_v17 = vpop.f32.mrb[4].mxu0 }
 0x1bb   :  { %v704_v18 = vadd.f32 %v698_v15, %v692_v12  ;;  %v693_v19 = vmul.f32 %v390_v17, %v390_v17  ;;  %v684_v20 = vpop.f32.mrb[4].mxu1  ;;  %809 = vmatprep.mubr.f32.mxu0 %v708_v14  ;;  %v392_v21 = vpop.f32.mrb[5].mxu0  ;;  %v930_v22 = vadd.f32 %v708_v14, %v707_v10 }
 0x1bc   :  { %v709_v23 = vmul.f32 0.0025, %v703_v16  ;;  %v699_v24 = vmul.f32 %v684_v20, %v684_v20  ;;  %v694_v25 = vmul.f32 %v392_v21, %v392_v21  ;;  %v686_v26 = vpop.f32.mrb[5].mxu1  ;;  %810 = vmatmul.mubr.f32.vlgmr.msra.gmra.mrb[6].mxu0 %v707_v10  ;;  %v948_v21 = vlaneseq }
 0x1bd   :  { %v710_v27 = vmul.f32 0.0025, %v704_v18  ;;  %v700_v28 = vmul.f32 %v686_v26, %v686_v26  ;;  %931 = vadd.xlane.f32.xlu0 %v930_v22 }
 0x1be   :  { %v705_v29 = vadd.f32 %v699_v24, %v693_v19  ;;  %v949_v22 = vand.u32 127, %v948_v21 }
 0x1bf   :  { %v706_v30 = vadd.f32 %v700_v28, %v694_v25  ;;  %814 = vmatprep.mubr.f32.mxu0 %v710_v27  ;;  %v933_v31 = vadd.f32 %v710_v27, %v709_v23 }
 0x1c0   :  { %v711_v32 = vmul.f32 0.0025, %v705_v29  ;;  %815 = vmatmul.mubr.f32.gmra.mrb[8].mxu0 %v709_v23  ;;  %vm950_vm1 = vcmp.eq.s32.totalorder %v949_v22, 0 }
 0x1c1   :  { %v712_v33 = vmul.f32 0.0025, %v706_v30  ;;  %934 = vadd.xlane.f32.xlu0 %v933_v31 }
 0x1c3   :  { %819 = vmatprep.mubr.f32.mxu0 %v712_v33  ;;  %v936_v34 = vadd.f32 %v712_v33, %v711_v32 }
 0x1c4   :  { %820 = vmatmul.mubr.f32.gmra.mrb[10].mxu0 %v711_v32 }
 0x1c5   :  { %937 = vadd.xlane.f32.xlu1 %v936_v34 }
 0x24a   :  { %v932_v15 = vpop.xlane.xlu0 %931 }
 0x24b   :  { %v939_v16 = vmax.f32 %v932_v15, 2.220446e-16 }
 0x24e   :  { %v935_v17 = vpop.xlane.xlu0 %934 }
 0x24f   :  { %v940_v18 = vmax.f32 %v935_v17, 2.220446e-16 }
 0x252   :  { %v938_v19 = vpop.xlane.xlu1 %937 }
 0x253   :  { %v941_v20 = vmax.f32 %v938_v19, 2.220446e-16 }
 0x28f   :  { %v1008_v61 = vpop.f32.mrb[6].mxu0 }
 0x290   :  { %v1009_v62 = vpop.f32.mrb[7].mxu0 }
 0x291   :  { %v1010_v63 = vadd.f32 %v1009_v62, %v1008_v61 }
 0x293   :  { %v825_v0 = vmax.f32 %v1010_v63, 2.220446e-16  ;;  %v1011_v1 = vpop.f32.mrb[8].mxu0 }
 0x294   :  { %v1012_v2 = vpop.f32.mrb[9].mxu0 }
 0x295   :  { %1416 = vlog2.f32 %v825_v0  ;;  %v1013_v3 = vadd.f32 %v1012_v2, %v1011_v1 }
 0x297   :  { %v826_v4 = vmax.f32 %v1013_v3, 2.220446e-16  ;;  %v1014_v5 = vpop.f32.mrb[10].mxu0 }
 0x298   :  { %v1015_v6 = vpop.f32.mrb[11].mxu0 }
 0x299   :  { %1418 = vlog2.f32 %v826_v4  ;;  %v1016_v7 = vadd.f32 %v1015_v6, %v1014_v5 }
 0x29b   :  { %v827_v8 = vmax.f32 %v1016_v7, 2.220446e-16 }
 0x29d   :  { %1420 = vlog2.f32 %v827_v8 }
 0x29e   :  { %1422 = vlog2.f32 %v939_v16 }
 0x29f   :  { %v1417_v9 = vpop.eup %1416  ;;  %1424 = vlog2.f32 %v940_v18 }
 0x2a0   :  { %v829_v10 = vmul.f32 0.6931472, %v1417_v9  ;;  %1426 = vlog2.f32 %v941_v20 }
 0x2a2   :  { %1069 = vmatmul.mubr.f32.vlgmr.msra.gmra.mrb[6].mxu1 %v829_v10 }
 0x2a3   :  { %v1419_v11 = vpop.eup %1418  ;;  %1071 = vmatprep.mubr.msk.f32.mxu1 %vm1580_vm0, %v1581_v60 }
 0x2a4   :  { %v831_v12 = vmul.f32 0.6931472, %v1419_v11 }
 0x2a6   :  { %1072 = vmatmul.mubr.f32.gmra.mrb[8].mxu1 %v831_v12 }
 0x2a7   :  { %v1421_v13 = vpop.eup %1420  ;;  %1074 = vmatprep.mubr.msk.f32.mxu1 %vm1580_vm0, %v1581_v60 }
 0x2a8   :  { %v833_v14 = vmul.f32 0.6931472, %v1421_v13  ;;  %v1423_v23 = vpop.eup %1422 }
 0x2a9   :  { %v943_v24 = vmul.f32 0.6931472, %v1423_v23  ;;  %v1425_v25 = vpop.eup %1424 }
 0x2aa   :  { %1075 = vmatmul.mubr.f32.gmra.mrb[10].mxu1 %v833_v14  ;;  %v945_v29 = vmul.f32 0.6931472, %v1425_v25  ;;  %v1427_v30 = vpop.eup %1426 }
 0x2ab   :  { %v947_v34 = vmul.f32 0.6931472, %v1427_v30 }
 0x375   :  { %v916_v26 = vpop.f32.mrb[6].mxu1 }
 0x376   :  { %v951_v27 = vsel %vm950_vm1, %v943_v24, %v916_v26  ;;  %v1070_v28 = vpop.f32.mrb[7].mxu1 }
 0x377   :  { %954 = vst [vmem:[#allocation11] sm:$0xff] %v951_v27 }
 0x379   :  { %v921_v31 = vpop.f32.mrb[8].mxu1 }
 0x37a   :  { %v952_v32 = vsel %vm950_vm1, %v945_v29, %v921_v31  ;;  %v1073_v33 = vpop.f32.mrb[9].mxu1 }
 0x37b   :  { %955 = vst [vmem:[#allocation11 + $0x8] sm:$0xff] %v952_v32 }
 0x37d   :  { %v926_v35 = vpop.f32.mrb[10].mxu1 }
 0x37e   :  { %v953_v36 = vsel %vm950_vm1, %v947_v34, %v926_v35  ;;  %v1076_v37 = vpop.f32.mrb[11].mxu1 }
 0x37f   :  { %956 = vst [vmem:[#allocation11 + $0x10] sm:$0xff] %v953_v36 }
 0x380   :  { %1549 = shalt.err (!%p1546_p2)
}
 0x381   :  { %s1550_s11 = scalar_lea.hbm %s1711_s5, 384 }
 0x382   :  { %p1551_p3 = scmp.ne.s32.totalorder %s1711_s5, %s1550_s11  ;;  %p1554_p4 = scmp.lt.u32.totalorder %s1550_s11, %s1711_s5 }
 0x384   :  { %p1556_p5 = pnand %p1554_p4, %p1551_p3 }
 0x386   :  { %1559 = shalt.err (!%p1556_p5)
}
 0x387   :  { %968 = dma.vmem_to_hbm [thread:$0]  %s963_s29, 384, %s1711_s5, [#allocation4], %s1572_s1, %s1572_s1, %s1573_s17  }
 0x388   :  { %1566 = dma.done.wait [#allocation4], 384  }
 0x389   :  { %1567 = vsyncadd [#allocation4], 4294966912 }
 0x38a   :  { %972 = vsyncpa [#allocation3], 1 }
 0x38b   :  { %973 = vsyncpa [#allocation6], 1 }
 0x38c   :  { %974 = vsyncpa [#allocation9], 1 }
 0x38d   :  { %975 = vsyncpa [#allocation4], 1 }

</bundles_post_ra>
